<compile_context>
chip_gen: v7x
topology: tpu7x:2x2x1
jax: 0.10.0
libtpu: 0.0.40
codegen_flags: <defaults>
</compile_context>

<pallas_src>
import functools

import numpy as np
import jax
import jax.numpy as jnp
from jax.experimental import pallas as pl
from jax.experimental.pallas import tpu as pltpu


# ----------------------------------------------------------------------------
# Tile helpers
# ----------------------------------------------------------------------------

def _divisor_tile(total, cap, multiple_of=1):
    """Largest divisor of `total` that is <= cap and a multiple of
    `multiple_of`; falls back to `total` (full extent, legal on leading dims)."""
    total = int(total)
    cap = int(max(1, min(cap, total)))
    for t in range(cap, 0, -1):
        if total % t == 0 and t % multiple_of == 0:
            return t
    return total


def _pick_tile(total, cap, align):
    """Largest divisor of `total` <= cap that is a multiple of `align`;
    falls back to the full extent (always a legal block)."""
    total = int(total)
    if total <= cap:
        return total
    t = (cap // align) * align
    while t >= align:
        if total % t == 0:
            return t
        t -= align
    return total


def _upsample2(x):
    """nn.Upsample(scale_factor=2, mode='nearest'), NHWC (JAX fallback)."""
    N, H, W, C = x.shape
    x = jnp.broadcast_to(x[:, :, None, :, None, :], (N, H, 2, W, 2, C))
    return x.reshape(N, 2 * H, 2 * W, C)


# ----------------------------------------------------------------------------
# Direct conv kernel (stride-1 3x3, optional folded 2x upsample, optional
# fused GroupNorm statistics).  Grid = (batch, output-row blocks); the padded
# sample and the weights stay resident in VMEM across the row blocks.
# ----------------------------------------------------------------------------

def _direct_conv_kernel_factory(n_in, TH, Wout, cout, upsample, emit_stats,
                                out_dtype):
    KH = KW = 3

    def kernel(*refs):
        x_refs = refs[:n_in]
        w_refs = refs[n_in:2 * n_in]
        b_ref = refs[2 * n_in]
        y_ref = refs[2 * n_in + 1]
        stats_ref = refs[2 * n_in + 2] if emit_stats else None
        hb = pl.program_id(1)
        off = 1 if upsample else 0

        acc = jnp.zeros((TH * Wout, cout), jnp.float32)
        for idx in range(n_in):
            w_ref = w_refs[idx]
            if upsample:
                # window of original-resolution rows; row-double it in VMEM so
                # tap (kh, kw) is winU[kh+1 : kh+1+TH, kw+1 : kw+1+Wout].
                h0 = pl.multiple_of(hb * (TH // 2), max(TH // 2, 1))
                win = x_refs[idx][0, pl.ds(h0, TH // 2 + 2)].astype(jnp.float32)
                r, wcols, cin = win.shape
                win = jnp.broadcast_to(win[:, None], (r, 2, wcols, cin))
                win = win.reshape(2 * r, wcols, cin)
            else:
                h0 = pl.multiple_of(hb * TH, TH)
                win = x_refs[idx][0, pl.ds(h0, TH + 2)].astype(jnp.float32)
                cin = win.shape[2]
            for kw in range(KW):
                winw = win[:, kw + off: kw + off + Wout, :]
                for kh in range(KH):
                    a = winw[kh + off: kh + off + TH]
                    a = a.reshape(TH * Wout, cin).astype(jnp.bfloat16)
                    acc = acc + jnp.dot(a, w_ref[kh, kw],
                                        preferred_element_type=jnp.float32)
        acc = acc + b_ref[...]

        if emit_stats:
            @pl.when(hb == 0)
            def _():
                stats_ref[...] = jnp.zeros_like(stats_ref)
            s1 = jnp.sum(acc, axis=0, keepdims=True)
            s2 = jnp.sum(acc * acc, axis=0, keepdims=True)
            stats_ref[...] += jnp.concatenate([s1, s2], axis=0)[None]

        y_ref[0] = acc.reshape(TH, Wout, cout).astype(out_dtype)

    return kernel


@functools.partial(jax.jit,
                   static_argnames=("upsample", "emit_stats", "out_dtype"))
def _conv2d_direct(xs, w, bias, *, upsample, emit_stats, out_dtype):
    xs = tuple(x.astype(jnp.bfloat16) for x in xs)
    n_in = len(xs)
    KH, KW, cin_total, cout = w.shape
    N, H, W, _ = xs[0].shape
    Ho = 2 * H if upsample else H
    Wout = 2 * W if upsample else W

    # zero-pad once (and column-double when the 2x nearest upsample is folded)
    xps = []
    for x in xs:
        xp = jnp.pad(x, ((0, 0), (1, 1), (1, 1), (0, 0)))
        if upsample:
            xp = jnp.repeat(xp, 2, axis=2)       # (N, H+2, 2W+4, C)
        xps.append(xp)

    # split the weight along the logically-concatenated input channels
    w_parts, c_off = [], 0
    for x in xs:
        ci = x.shape[-1]
        w_parts.append(w[:, :, c_off:c_off + ci, :].astype(jnp.bfloat16))
        c_off += ci
    b2 = bias.reshape(1, cout).astype(jnp.float32)

    # output-row tile: divisor of Ho, bounded so the f32 accumulator and the
    # f32 window copies stay small (a couple of MiB at most).
    cap = max(1, (1 << 20) // max(1, Wout * cout * 4))
    if upsample:
        TH = _divisor_tile(Ho, max(2, cap), 2)
    else:
        TH = _divisor_tile(Ho, cap, 1)
    n_hb = Ho // TH

    kernel = _direct_conv_kernel_factory(n_in, TH, Wout, cout, upsample,
                                         emit_stats, out_dtype)

    in_specs = []
    for xp in xps:
        shp = xp.shape
        in_specs.append(pl.BlockSpec((1,) + shp[1:],
                                     lambda n, hb: (n, 0, 0, 0)))
    for wp in w_parts:
        in_specs.append(pl.BlockSpec(wp.shape, lambda n, hb: (0, 0, 0, 0)))
    in_specs.append(pl.BlockSpec((1, cout), lambda n, hb: (0, 0)))

    if emit_stats:
        out_shape = (jax.ShapeDtypeStruct((N, Ho, Wout, cout), out_dtype),
                     jax.ShapeDtypeStruct((N, 2, cout), jnp.float32))
        out_specs = (
            pl.BlockSpec((1, TH, Wout, cout), lambda n, hb: (n, hb, 0, 0)),
            pl.BlockSpec((1, 2, cout), lambda n, hb: (n, 0, 0)),
        )
    else:
        out_shape = jax.ShapeDtypeStruct((N, Ho, Wout, cout), out_dtype)
        out_specs = pl.BlockSpec((1, TH, Wout, cout),
                                 lambda n, hb: (n, hb, 0, 0))

    flops = 2 * N * Ho * Wout * cout * (KH * KW * cin_total)
    out_bytes = N * Ho * Wout * cout * (2 if out_dtype == jnp.bfloat16 else 4)
    bytes_acc = int(sum(int(np.prod(xp.shape)) for xp in xps) * 2
                    + int(np.prod(w.shape)) * 2 + out_bytes)

    res = pl.pallas_call(
        kernel,
        out_shape=out_shape,
        grid_spec=pltpu.PrefetchScalarGridSpec(
            num_scalar_prefetch=0,
            grid=(N, n_hb),
            in_specs=in_specs,
            out_specs=out_specs,
        ),
        compiler_params=pltpu.CompilerParams(
            dimension_semantics=("parallel", "arbitrary")),
        cost_estimate=pl.CostEstimate(flops=int(flops), transcendentals=0,
                                      bytes_accessed=bytes_acc),
    )(*(list(xps) + list(w_parts) + [b2]))

    if emit_stats:
        return res[0], res[1]
    return res, None


# ----------------------------------------------------------------------------
# im2col tiled-matmul conv (stride-2 3x3 convs, 1x1 downsamples and the tiny
# deep layers).  K-axis accumulation in a f32 VMEM scratch, bf16 store on the
# last K step.
# ----------------------------------------------------------------------------

def _mm_kernel(a_ref, b_ref, bias_ref, o_ref, acc_ref):
    k = pl.program_id(2)

    @pl.when(k == 0)
    def _():
        acc_ref[...] = jnp.zeros_like(acc_ref)

    acc_ref[...] += jnp.dot(a_ref[...], b_ref[...],
                            preferred_element_type=jnp.float32)

    @pl.when(k == pl.num_programs(2) - 1)
    def _():
        o_ref[...] = (acc_ref[...] + bias_ref[...]).astype(o_ref.dtype)


@functools.partial(jax.jit,
                   static_argnames=("stride", "padding", "upsample",
                                    "out_dtype"))
def _conv2d_im2col(xs, w, bias, *, stride, padding, upsample, out_dtype):
    if upsample:
        xs = tuple(_upsample2(x) for x in xs)
    xs = tuple(x.astype(jnp.bfloat16) for x in xs)
    N, H, W, _ = xs[0].shape
    KH, KW, cin_total, cout = w.shape
    Ho = (H + 2 * padding - KH) // stride + 1
    Wo = (W + 2 * padding - KW) // stride + 1
    if padding:
        xs = tuple(jnp.pad(x, ((0, 0), (padding, padding),
                               (padding, padding), (0, 0))) for x in xs)
    M = N * Ho * Wo
    K = KH * KW * cin_total

    taps = []
    for kh in range(KH):
        for kw in range(KW):
            for xi in xs:
                taps.append(xi[:, kh:kh + stride * Ho:stride,
                               kw:kw + stride * Wo:stride, :])
    a = taps[0] if len(taps) == 1 else jnp.concatenate(taps, axis=-1)
    a = a.reshape(M, K)
    wt = w.reshape(K, cout).astype(jnp.bfloat16)
    b2 = bias.reshape(1, cout).astype(jnp.float32)

    tm = _pick_tile(M, 1024, 16)
    tk = _pick_tile(K, 512, 128)
    tn = _pick_tile(cout, 256, 128)
    grid = (M // tm, cout // tn, K // tk)

    out = pl.pallas_call(
        _mm_kernel,
        out_shape=jax.ShapeDtypeStruct((M, cout), out_dtype),
        grid_spec=pltpu.PrefetchScalarGridSpec(
            num_scalar_prefetch=0,
            grid=grid,
            in_specs=[
                pl.BlockSpec((tm, tk), lambda i, j, k: (i, k)),
                pl.BlockSpec((tk, tn), lambda i, j, k: (k, j)),
                pl.BlockSpec((1, tn), lambda i, j, k: (0, j)),
            ],
            out_specs=pl.BlockSpec((tm, tn), lambda i, j, k: (i, j)),
            scratch_shapes=[pltpu.VMEM((tm, tn), jnp.float32)],
        ),
        compiler_params=pltpu.CompilerParams(
            dimension_semantics=("parallel", "parallel", "arbitrary")),
        cost_estimate=pl.CostEstimate(
            flops=int(2 * M * K * cout), transcendentals=0,
            bytes_accessed=int(M * K * 2 + K * cout * 2 + M * cout * 2)),
    )(a, wt, b2)
    return out.reshape(N, Ho, Wo, cout)


def conv2d(x, w, bias=None, *, stride=1, padding=0, upsample=False,
           emit_stats=False, out_dtype=jnp.bfloat16):
    """Conv2d on NHWC inputs (x may be a tuple for a folded channel concat).
    Returns (y, stats) where stats is (N,2,Cout) per-channel sum/sum-of-squares
    when the direct path could fuse them, else None."""
    xs = tuple(x) if isinstance(x, (tuple, list)) else (x,)
    if bias is None:
        bias = jnp.zeros((w.shape[-1],), jnp.float32)
    N, H, W, _ = xs[0].shape
    wout = 2 * W if upsample else W
    direct_ok = (stride == 1 and padding == 1 and w.shape[0] == 3
                 and w.shape[1] == 3 and wout % 8 == 0)
    if direct_ok:
        try:
            return _conv2d_direct(xs, w, bias, upsample=upsample,
                                  emit_stats=emit_stats, out_dtype=out_dtype)
        except Exception:
            pass  # fall back to the (known-good) im2col path
    y = _conv2d_im2col(xs, w, bias, stride=stride, padding=padding,
                       upsample=upsample, out_dtype=out_dtype)
    return y, None


# ----------------------------------------------------------------------------
# GroupNorm(8) + affine (+ residual) (+ CELU), using fused conv statistics
# when available.
# ----------------------------------------------------------------------------

def _channel_sums(x):
    xf = x.astype(jnp.float32)
    s1 = jnp.sum(xf, axis=(1, 2))
    s2 = jnp.sum(xf * xf, axis=(1, 2))
    return jnp.stack([s1, s2], axis=1)                     # (N, 2, C)


def _norm_kernel_factory(act, has_res):
    def kernel(x_ref, sc_ref, sh_ref, *rest):
        if has_res:
            r_ref, o_ref = rest
        else:
            (o_ref,) = rest
        y = x_ref[0].astype(jnp.float32) * sc_ref[0] + sh_ref[0]
        if has_res:
            y = y + r_ref[0].astype(jnp.float32)
        if act:
            # CELU(alpha=1): x for x>0 else exp(x)-1 (clamped exp argument).
            y = jnp.where(y > 0.0, y, jnp.exp(jnp.minimum(y, 0.0)) - 1.0)
        o_ref[0] = y.astype(o_ref.dtype)
    return kernel


@functools.partial(jax.jit,
                   static_argnames=("n_groups", "act", "eps", "out_dtype"))
def _gn_act(x, gamma, beta, stats, residual, *, n_groups, act, eps, out_dtype):
    N, H, W, C = x.shape
    HW = H * W
    G = n_groups
    Cg = C // G
    if stats is None:
        stats = _channel_sums(x)                            # (N, 2, C) f32
    count = float(HW * Cg)
    sg = stats.reshape(N, 2, G, Cg).sum(axis=-1)            # (N, 2, G)
    mean_g = sg[:, 0, :] / count
    var_g = jnp.maximum(sg[:, 1, :] / count - mean_g * mean_g, 0.0)
    inv_g = jax.lax.rsqrt(var_g + eps)
    mean_c = jnp.repeat(mean_g, Cg, axis=1)                 # (N, C)
    inv_c = jnp.repeat(inv_g, Cg, axis=1)
    scale = (inv_c * gamma[None, :]).reshape(N, 1, C).astype(jnp.float32)
    shift = (beta[None, :] - mean_c * inv_c * gamma[None, :]
             ).reshape(N, 1, C).astype(jnp.float32)

    x2 = x.reshape(N, HW, C)
    thw = _divisor_tile(HW, max(8, (1 << 19) // max(1, C)), 1)
    nT = HW // thw

    has_res = residual is not None
    inputs = [x2, scale, shift]
    in_specs = [
        pl.BlockSpec((1, thw, C), lambda n, t: (n, t, 0)),
        pl.BlockSpec((1, 1, C), lambda n, t: (n, 0, 0)),
        pl.BlockSpec((1, 1, C), lambda n, t: (n, 0, 0)),
    ]
    if has_res:
        inputs.append(residual.reshape(N, HW, C))
        in_specs.append(pl.BlockSpec((1, thw, C), lambda n, t: (n, t, 0)))

    out = pl.pallas_call(
        _norm_kernel_factory(act, has_res),
        out_shape=jax.ShapeDtypeStruct((N, HW, C), out_dtype),
        grid_spec=pltpu.PrefetchScalarGridSpec(
            num_scalar_prefetch=0,
            grid=(N, nT),
            in_specs=in_specs,
            out_specs=pl.BlockSpec((1, thw, C), lambda n, t: (n, t, 0)),
        ),
        compiler_params=pltpu.CompilerParams(
            dimension_semantics=("parallel", "parallel")),
    )(*inputs)
    return out.reshape(N, H, W, C)


def gn_act(x, gamma, beta, *, stats=None, residual=None, n_groups=8, act=True,
           eps=1e-5):
    return _gn_act(x, gamma, beta, stats, residual, n_groups=n_groups,
                   act=act, eps=eps, out_dtype=jnp.bfloat16)


# ----------------------------------------------------------------------------
# MaxPool2d(3, stride=2, ceil_mode=True) — 9-tap max on 4 parity-split views.
# ----------------------------------------------------------------------------

def _maxpool_kernel(ee_ref, eo_ref, oe_ref, oo_ref, o_ref):
    Ho = o_ref.shape[1]
    Wo = o_ref.shape[2]
    ee = ee_ref[0].astype(jnp.float32)
    eo = eo_ref[0].astype(jnp.float32)
    oe = oe_ref[0].astype(jnp.float32)
    oo = oo_ref[0].astype(jnp.float32)
    m = ee[0:Ho, 0:Wo]
    m = jnp.maximum(m, eo[0:Ho, 0:Wo])
    m = jnp.maximum(m, ee[0:Ho, 1:Wo + 1])
    m = jnp.maximum(m, oe[0:Ho, 0:Wo])
    m = jnp.maximum(m, oo[0:Ho, 0:Wo])
    m = jnp.maximum(m, oe[0:Ho, 1:Wo + 1])
    m = jnp.maximum(m, ee[1:Ho + 1, 0:Wo])
    m = jnp.maximum(m, eo[1:Ho + 1, 0:Wo])
    m = jnp.maximum(m, ee[1:Ho + 1, 1:Wo + 1])
    o_ref[0] = m.astype(o_ref.dtype)


@jax.jit
def _maxpool_pallas(x):
    N, H, W, C = x.shape
    Ho = -((H - 3) // -2) + 1
    Wo = -((W - 3) // -2) + 1
    Hp, Wp = 2 * Ho + 1, 2 * Wo + 1
    xp = jnp.pad(x, ((0, 0), (0, Hp - H), (0, Wp - W), (0, 0)),
                 constant_values=-jnp.inf)
    ee = xp[:, 0::2, 0::2, :]                                # (N, Ho+1, Wo+1, C)
    eo = xp[:, 0::2, 1::2, :]                                # (N, Ho+1, Wo,   C)
    oe = xp[:, 1::2, 0::2, :]                                # (N, Ho,   Wo+1, C)
    oo = xp[:, 1::2, 1::2, :]                                # (N, Ho,   Wo,   C)

    def spec(arr):
        return pl.BlockSpec((1,) + arr.shape[1:], lambda n: (n, 0, 0, 0))

    return pl.pallas_call(
        _maxpool_kernel,
        out_shape=jax.ShapeDtypeStruct((N, Ho, Wo, C), x.dtype),
        grid_spec=pltpu.PrefetchScalarGridSpec(
            num_scalar_prefetch=0,
            grid=(N,),
            in_specs=[spec(ee), spec(eo), spec(oe), spec(oo)],
            out_specs=pl.BlockSpec((1, Ho, Wo, C), lambda n: (n, 0, 0, 0)),
        ),
        compiler_params=pltpu.CompilerParams(
            dimension_semantics=("parallel",)),
    )(ee, eo, oe, oo)


@jax.jit
def _maxpool_ref(x):
    N, H, W, C = x.shape
    Ho = -((H - 3) // -2) + 1
    Wo = -((W - 3) // -2) + 1
    Hp, Wp = 2 * Ho + 1, 2 * Wo + 1
    xp = jnp.pad(x, ((0, 0), (0, Hp - H), (0, Wp - W), (0, 0)),
                 constant_values=-jnp.inf)
    out = None
    for kh in range(3):
        for kw in range(3):
            t = xp[:, kh:kh + 2 * Ho:2, kw:kw + 2 * Wo:2, :]
            out = t if out is None else jnp.maximum(out, t)
    return out


def maxpool_3x3_s2_ceil(x):
    try:
        return _maxpool_pallas(x)
    except Exception:
        return _maxpool_ref(x)


# ----------------------------------------------------------------------------
# Deterministic parameter init (synthetic — no checkpoint loading)
# ----------------------------------------------------------------------------

FEATURE_SIZES = [64, 64, 128, 256, 512]                    # resnet34 encoder
RESNET34_LAYERS = [(64, 3, 1), (128, 4, 2), (256, 6, 2), (512, 3, 2)]


class KeyGen:
    def __init__(self, key):
        self.key = key

    def __call__(self):
        self.key, sub = jax.random.split(self.key)
        return sub


def conv_w(key, kh, kw, cin, cout):
    fan_in = kh * kw * cin
    return jax.random.normal(key, (kh, kw, cin, cout), jnp.float32) * np.sqrt(
        2.0 / fan_in).astype(np.float32)


def gn_p(kg, c):
    gamma = 1.0 + 0.05 * jax.random.normal(kg(), (c,), jnp.float32)
    beta = 0.05 * jax.random.normal(kg(), (c,), jnp.float32)
    return (gamma, beta)


def init_params(key, in_channels, out_channels):
    kg = KeyGen(key)
    p = {}
    p["layer0"] = [
        dict(w=conv_w(kg(), 3, 3, in_channels, 64), gn=gn_p(kg, 64)),
        dict(w=conv_w(kg(), 3, 3, 64, 64), gn=gn_p(kg, 64)),
        dict(w=conv_w(kg(), 3, 3, 64, 64), gn=gn_p(kg, 64)),
    ]
    layers = []
    cin = 64
    for planes, nblocks, stride in RESNET34_LAYERS:
        blocks = []
        for b in range(nblocks):
            s = stride if b == 0 else 1
            bc_in = cin if b == 0 else planes
            blk = dict(
                conv1=conv_w(kg(), 3, 3, bc_in, planes), gn1=gn_p(kg, planes),
                conv2=conv_w(kg(), 3, 3, planes, planes), gn2=gn_p(kg, planes),
                downsample=None)
            if s != 1 or bc_in != planes:
                blk["downsample"] = dict(w=conv_w(kg(), 1, 1, bc_in, planes),
                                         gn=gn_p(kg, planes))
            blocks.append(blk)
        layers.append(blocks)
        cin = planes
    p["layers"] = layers
    enc = FEATURE_SIZES
    p["dec_blocks"] = [
        dict(w=conv_w(kg(), 3, 3, enc[i], enc[i - 1]), gn=gn_p(kg, enc[i - 1]))
        for i in reversed(range(1, len(enc)))
    ]
    p["linkers"] = [
        dict(w=conv_w(kg(), 3, 3, 2 * f, f), gn=gn_p(kg, f))
        for f in reversed(enc[:-1])
    ]
    # NOTE: Decoder.__init__ builds SEModules but Decoder.forward never calls
    # them (zipped and ignored) -> no parameters needed.
    p["last_up"] = dict(w=conv_w(kg(), 3, 3, enc[0], enc[0] // 2),
                        gn=gn_p(kg, enc[0] // 2))
    p["final"] = dict(w=conv_w(kg(), 3, 3, enc[0] // 2, out_channels),
                      b=0.05 * jax.random.normal(kg(), (out_channels,),
                                                 jnp.float32))
    return p


# ----------------------------------------------------------------------------
# Forward pass
# ----------------------------------------------------------------------------

def basic_block(p, x, stride):
    out, st1 = conv2d(x, p["conv1"], stride=stride, padding=1,
                      emit_stats=True)
    out = gn_act(out, *p["gn1"], stats=st1, act=True)
    out, st2 = conv2d(out, p["conv2"], stride=1, padding=1, emit_stats=True)
    if p["downsample"] is not None:
        identity, _ = conv2d(x, p["downsample"]["w"], stride=stride, padding=0)
        identity = gn_act(identity, *p["downsample"]["gn"], act=False)
    else:
        identity = x
    # out = CELU(GN(out) + identity)
    return gn_act(out, *p["gn2"], stats=st2, residual=identity, act=True)


def unet_forward(params, x_nchw):
    # NCHW in/out, bf16 NHWC internally.
    x = jnp.transpose(x_nchw, (0, 2, 3, 1)).astype(jnp.bfloat16)

    # --- Encoder ---
    p0 = params["layer0"]
    h, st = conv2d(x, p0[0]["w"], stride=2, padding=1, emit_stats=True)
    h = gn_act(h, *p0[0]["gn"], stats=st, act=True)
    for lp in p0[1:]:
        h, st = conv2d(h, lp["w"], stride=1, padding=1, emit_stats=True)
        h = gn_act(h, *lp["gn"], stats=st, act=True)
    x0 = h
    h = maxpool_3x3_s2_ceil(x0)

    feats = []
    for li, (planes, nblocks, stride) in enumerate(RESNET34_LAYERS):
        for b, blk in enumerate(params["layers"][li]):
            h = basic_block(blk, h, stride if b == 0 else 1)
        feats.append(h)
    x1, x2, x3, x4 = feats

    # --- Decoder ---
    enc_features = [x3, x2, x1, x0]
    d = x4
    for enc_f, dec_p, lnk_p in zip(enc_features, params["dec_blocks"],
                                   params["linkers"]):
        # DecoderBlock: upsample (folded) -> conv -> GN -> CELU
        y, st = conv2d(d, dec_p["w"], stride=1, padding=1, upsample=True,
                       emit_stats=True)
        d = gn_act(y, *dec_p["gn"], stats=st, act=True)
        # DecoderLinkerBlock: cat(channels) folded -> conv -> GN -> CELU
        y, st = conv2d((d, enc_f), lnk_p["w"], stride=1, padding=1,
                       emit_stats=True)
        d = gn_act(y, *lnk_p["gn"], stats=st, act=True)
        # SEModule is constructed in Decoder.__init__ but never applied in
        # Decoder.forward -> intentionally skipped.
    # last_upsample (DecoderBlock 64 -> 32)
    y, st = conv2d(d, params["last_up"]["w"], stride=1, padding=1,
                   upsample=True, emit_stats=True)
    d = gn_act(y, *params["last_up"]["gn"], stats=st, act=True)
    # final conv (with bias, no norm/activation), f32 output
    out, _ = conv2d(d, params["final"]["w"], params["final"]["b"],
                    stride=1, padding=1, out_dtype=jnp.float32)
    return jnp.transpose(out, (0, 3, 1, 2))


# ----------------------------------------------------------------------------

if __name__ == "__main__":
    key = jax.random.PRNGKey(0)
    pkey, xkey = jax.random.split(key)

    in_channels, out_channels = 3, 4
    N, H, W = 2, 32, 32                                    # small but deep enough
    params = init_params(pkey, in_channels, out_channels)
    x = jax.random.normal(xkey, (N, in_channels, H, W), jnp.float32)

    out = unet_forward(params, x)
    out = jax.block_until_ready(out)

    assert out.shape == (N, out_channels, H, W), out.shape
    assert bool(jnp.all(jnp.isfinite(out)))
    print("KERNEL_OK")
</pallas_src>

<mosaic_0001>
module attributes {stable_mosaic.version = 11 : i64} {
  func.func @_mm_kernel(%arg0: i32, %arg1: i32, %arg2: i32, %arg3: memref<512x27xbf16, #tpu.memory_space<vmem>>, %arg4: memref<27x64xbf16, #tpu.memory_space<vmem>>, %arg5: memref<1x64xf32, #tpu.memory_space<vmem>>, %arg6: memref<512x64xbf16, #tpu.memory_space<vmem>>, %arg7: memref<512x64xf32, #tpu.memory_space<vmem>>) attributes {dimension_semantics = [#tpu.dimension_semantics<parallel>, #tpu.dimension_semantics<parallel>, #tpu.dimension_semantics<arbitrary>], iteration_bounds = array<i64: 1, 1, 1>, scalar_prefetch = 0 : i64, scratch_operands = 1 : i64, tpu.core_type = #tpu.core_type<tc>, window_params = [{transform_indices = @transform_0, window_bounds = array<i64: 512, 27>}, {transform_indices = @transform_1, window_bounds = array<i64: 27, 64>}, {transform_indices = @transform_2, window_bounds = array<i64: 1, 64>}, {transform_indices = @transform_3, window_bounds = array<i64: 512, 64>}]} {
    %c0_i32 = arith.constant 0 : i32
    %0 = arith.cmpi eq, %arg2, %c0_i32 : i32
    %1 = arith.extui %0 : i1 to i32
    %c0_i32_0 = arith.constant 0 : i32
    %2 = arith.cmpi ne, %1, %c0_i32_0 : i32
    scf.if %2 {
      %cst_10 = arith.constant 0.000000e+00 : f32
      %12 = vector.broadcast %cst_10 : f32 to vector<512x64xf32>
      %c0_11 = arith.constant 0 : index
      %c0_12 = arith.constant 0 : index
      %13 = vector.load %arg7[%c0_11, %c0_12] : memref<512x64xf32, #tpu.memory_space<vmem>>, vector<512x64xf32>
      tpu.vector_store %arg7[%c0_11, %c0_12], %12 {strides = array<i32>} : memref<512x64xf32, #tpu.memory_space<vmem>>, vector<512x64xf32>,
    } else {
    }
    %c0 = arith.constant 0 : index
    %c0_1 = arith.constant 0 : index
    %3 = vector.load %arg7[%c0, %c0_1] : memref<512x64xf32, #tpu.memory_space<vmem>>, vector<512x64xf32>
    %c0_2 = arith.constant 0 : index
    %c0_3 = arith.constant 0 : index
    %4 = vector.load %arg3[%c0_2, %c0_3] : memref<512x27xbf16, #tpu.memory_space<vmem>>, vector<512x27xbf16>
    %c0_4 = arith.constant 0 : index
    %c0_5 = arith.constant 0 : index
    %5 = vector.load %arg4[%c0_4, %c0_5] : memref<27x64xbf16, #tpu.memory_space<vmem>>, vector<27x64xbf16>
    %cst = arith.constant dense<0.000000e+00> : vector<512x64xf32>
    %6 = tpu.matmul %4, %5, %cst {dimension_numbers = #tpu.dot_dimension_numbers<[1], [0], [0], [1], [0, 0, 1, 1], [], []>} : vector<512x27xbf16>, vector<27x64xbf16>, vector<512x64xf32> -> vector<512x64xf32>
    %7 = arith.addf %3, %6 : vector<512x64xf32>
    %c0_6 = arith.constant 0 : index
    %c0_7 = arith.constant 0 : index
    %8 = vector.load %arg7[%c0_6, %c0_7] : memref<512x64xf32, #tpu.memory_space<vmem>>, vector<512x64xf32>
    tpu.vector_store %arg7[%c0_6, %c0_7], %7 {strides = array<i32>} : memref<512x64xf32, #tpu.memory_space<vmem>>, vector<512x64xf32>,
    %c0_i32_8 = arith.constant 0 : i32
    %9 = arith.cmpi eq, %arg2, %c0_i32_8 : i32
    %10 = arith.extui %9 : i1 to i32
    %c0_i32_9 = arith.constant 0 : i32
    %11 = arith.cmpi ne, %10, %c0_i32_9 : i32
    scf.if %11 {
      %c0_10 = arith.constant 0 : index
      %c0_11 = arith.constant 0 : index
      %12 = vector.load %arg7[%c0_10, %c0_11] : memref<512x64xf32, #tpu.memory_space<vmem>>, vector<512x64xf32>
      %c0_12 = arith.constant 0 : index
      %c0_13 = arith.constant 0 : index
      %13 = vector.load %arg5[%c0_12, %c0_13] : memref<1x64xf32, #tpu.memory_space<vmem>>, vector<1x64xf32>
      %14 = vector.broadcast %13 : vector<1x64xf32> to vector<512x64xf32>
      %15 = arith.addf %12, %14 : vector<512x64xf32>
      %16 = arith.truncf %15 : vector<512x64xf32> to vector<512x64xbf16>
      %c0_14 = arith.constant 0 : index
      %c0_15 = arith.constant 0 : index
      %17 = vector.load %arg6[%c0_14, %c0_15] : memref<512x64xbf16, #tpu.memory_space<vmem>>, vector<512x64xbf16>
      tpu.vector_store %arg6[%c0_14, %c0_15], %16 {strides = array<i32>} : memref<512x64xbf16, #tpu.memory_space<vmem>>, vector<512x64xbf16>,
    } else {
    }
    return
  }
  func.func @transform_0(%arg0: i32, %arg1: i32, %arg2: i32) -> (i32, i32) {
    %c0_i32 = arith.constant 0 : i32
    return %arg0, %arg2 : i32, i32
  }
  func.func @transform_1(%arg0: i32, %arg1: i32, %arg2: i32) -> (i32, i32) {
    %c0_i32 = arith.constant 0 : i32
    return %arg2, %arg1 : i32, i32
  }
  func.func @transform_2(%arg0: i32, %arg1: i32, %arg2: i32) -> (i32, i32) {
    %c0_i32 = arith.constant 0 : i32
    %c0_i32_0 = arith.constant 0 : i32
    return %c0_i32, %arg1 : i32, i32
  }
  func.func @transform_3(%arg0: i32, %arg1: i32, %arg2: i32) -> (i32, i32) {
    %c0_i32 = arith.constant 0 : i32
    return %arg0, %arg1 : i32, i32
  }
}

</mosaic_0001>

<bundles_post_ra>
// kernel: _conv2d_im2col.1
= control target key start
LH: loop header
LB: loop body
LE: loop exit
PB: predicated region body
PF: predicated region fallthrough
CT: control target
= control target key end

     0   :  { %vm485_vm0 = vcmask 1044480   ;;  %vm486_vm1 = vcmask 1045504   ;;  %v1749_v2 = vmov 65535   ;;  %vm388_vm2 = vcmask 220160   ;;  %s2257_s0 = inlined_call_operand.vmem [shape: bf16[512,27], index: 0, kind: input, shape index: {}]   ;;  %s2258_s1 = inlined_call_operand.vmem [shape: bf16[27,64], index: 1, kind: input, shape index: {}]   ;;  %s2259_s2 = inlined_call_operand.vmem [shape: f32[1,64], index: 2, kind: input, shape index: {}]   ;;  %s2260_s3 = inlined_call_operand.hbm [shape: bf16[512,64], index: 3, kind: output, shape index: {}]  }
   0x1   :  { %v1691_v0 = vld [vmem:[%s2258_s1] sm:$0xff]   ;;  %v1692_v1 = vld [vmem:[%s2258_s1 + $0x8] sm:$0x3f]   ;;  %v487_v3 = vsel %vm485_vm0, 4294967295, %v1749_v2  ;;  %vm20_vm3 = vcmask 523264   ;;  %v1801_v10 = vld [vmem:[%s2257_s0 + $0x10] sm:$0xff]  }
   0x2   :  { %1614 = vmatprep.subr.bf16.mxu0 %v1691_v0  ;;  %1682 = vmatprep.subr.bf16.mxu1 %v1691_v0  ;;  %v1693_v4 = vld [vmem:[%s2257_s0] sm:$0xff]   ;;  %v488_v6 = vsel %vm486_vm1, %v487_v3, 0  ;;  %v1791_v8 = vld [vmem:[%s2257_s0 + $0x8] sm:$0xff]   ;;  %v1806_v11 = vld [vmem:[%s2257_s0 + $0x90] sm:$0xff]   ;;  %v1750_v12 = vmov 0.0  }
   0x3   :  { %1615 = vmatpush3.bf16.msra.mxu0 %v1691_v0  ;;  %1684 = vmatpush3.bf16.msra.mxu1 %v1691_v0  ;;  %v1694_v5 = vld [vmem:[%s2257_s0 + $0x80] sm:$0xff]   ;;  %v490_v7 = vand.u32 %v1692_v1, %v488_v6  ;;  %v1796_v9 = vld [vmem:[%s2257_s0 + $0x88] sm:$0xff]   ;;  %23 = vst.msk [vmem:[#allocation2 + $0x10] sm:$0xff] %vm20_vm3, %v1750_v12  ;;  %21 = vst.msk [vmem:[#allocation2] sm:$0xff] %vm20_vm3, %v1750_v12 }
   0x4   :  { %1618 = vmatprep.mubr.msk.bf16.mxu0 %vm388_vm2, %v1693_v4  ;;  %1650 = vmatprep.mubr.msk.bf16.mxu1 %vm388_vm2, %v1694_v5  ;;  %22 = vst.msk [vmem:[#allocation2 + $0x8] sm:$0xff] %vm20_vm3, %v1750_v12  ;;  %24 = vst.msk [vmem:[#allocation2 + $0x18] sm:$0xff] %vm20_vm3, %v1750_v12  ;;  %v1699_v13 = vld [vmem:[%s2257_s0 + $0x18] sm:$0xff]   ;;  %v1701_v15 = vld [vmem:[%s2257_s0 + $0x20] sm:$0xff]  }
   0x5   :  { %1616 = vmatprep.subr.bf16.mxu0 %v490_v7  ;;  %1683 = vmatprep.subr.bf16.mxu1 %v490_v7  ;;  %25 = vst.msk [vmem:[#allocation2 + $0x20] sm:$0xff] %vm20_vm3, %v1750_v12  ;;  %26 = vst.msk [vmem:[#allocation2 + $0x28] sm:$0xff] %vm20_vm3, %v1750_v12  ;;  %v1700_v14 = vld [vmem:[%s2257_s0 + $0x98] sm:$0xff]   ;;  %v1702_v16 = vld [vmem:[%s2257_s0 + $0xa0] sm:$0xff]  }
   0x6   :  { %27 = vst.msk [vmem:[#allocation2 + $0x30] sm:$0xff] %vm20_vm3, %v1750_v12  ;;  %28 = vst.msk [vmem:[#allocation2 + $0x38] sm:$0xff] %vm20_vm3, %v1750_v12  ;;  %v1703_v17 = vld [vmem:[%s2257_s0 + $0x28] sm:$0xff]   ;;  %v1705_v19 = vld [vmem:[%s2257_s0 + $0x30] sm:$0xff]  }
   0x7   :  { %1617 = vmatpush3.bf16.msra.mxu0 %v490_v7  ;;  %1685 = vmatpush3.bf16.msra.mxu1 %v490_v7  ;;  %29 = vst.msk [vmem:[#allocation2 + $0x40] sm:$0xff] %vm20_vm3, %v1750_v12  ;;  %30 = vst.msk [vmem:[#allocation2 + $0x48] sm:$0xff] %vm20_vm3, %v1750_v12  ;;  %v1704_v18 = vld [vmem:[%s2257_s0 + $0xa8] sm:$0xff]   ;;  %v1706_v20 = vld [vmem:[%s2257_s0 + $0xb0] sm:$0xff]  }
   0x8   :  { %31 = vst.msk [vmem:[#allocation2 + $0x50] sm:$0xff] %vm20_vm3, %v1750_v12  ;;  %32 = vst.msk [vmem:[#allocation2 + $0x58] sm:$0xff] %vm20_vm3, %v1750_v12  ;;  %v1707_v21 = vld [vmem:[%s2257_s0 + $0x38] sm:$0xff]   ;;  %v1709_v23 = vld [vmem:[%s2257_s0 + $0x40] sm:$0xff]  }
   0x9   :  { %33 = vst.msk [vmem:[#allocation2 + $0x60] sm:$0xff] %vm20_vm3, %v1750_v12  ;;  %34 = vst.msk [vmem:[#allocation2 + $0x68] sm:$0xff] %vm20_vm3, %v1750_v12  ;;  %v1708_v22 = vld [vmem:[%s2257_s0 + $0xb8] sm:$0xff]   ;;  %v1710_v24 = vld [vmem:[%s2257_s0 + $0xc0] sm:$0xff]  }
   0xa   :  { %35 = vst.msk [vmem:[#allocation2 + $0x70] sm:$0xff] %vm20_vm3, %v1750_v12  ;;  %36 = vst.msk [vmem:[#allocation2 + $0x78] sm:$0xff] %vm20_vm3, %v1750_v12  ;;  %1619 = vmatmul.mubr.msk.bf16.vlgmr.msra.gmra.mrb[0].mxu0 %vm388_vm2, %v1791_v8  ;;  %1651 = vmatmul.mubr.msk.bf16.vlgmr.msra.gmra.mrb[0].mxu1 %vm388_vm2, %v1796_v9 }
   0xb   :  { %37 = vst.msk [vmem:[#allocation2 + $0x80] sm:$0xff] %vm20_vm3, %v1750_v12  ;;  %38 = vst.msk [vmem:[#allocation2 + $0x88] sm:$0xff] %vm20_vm3, %v1750_v12  ;;  %1622 = vmatprep.mubr.msk.bf16.mxu0 %vm388_vm2, %v1801_v10  ;;  %1654 = vmatprep.mubr.msk.bf16.mxu1 %vm388_vm2, %v1806_v11 }
   0xc   :  { %39 = vst.msk [vmem:[#allocation2 + $0x90] sm:$0xff] %vm20_vm3, %v1750_v12  ;;  %40 = vst.msk [vmem:[#allocation2 + $0x98] sm:$0xff] %vm20_vm3, %v1750_v12 }
   0xd   :  { %41 = vst.msk [vmem:[#allocation2 + $0xa0] sm:$0xff] %vm20_vm3, %v1750_v12  ;;  %42 = vst.msk [vmem:[#allocation2 + $0xa8] sm:$0xff] %vm20_vm3, %v1750_v12 }
   0xe   :  { %43 = vst.msk [vmem:[#allocation2 + $0xb0] sm:$0xff] %vm20_vm3, %v1750_v12  ;;  %44 = vst.msk [vmem:[#allocation2 + $0xb8] sm:$0xff] %vm20_vm3, %v1750_v12 }
   0xf   :  { %45 = vst.msk [vmem:[#allocation2 + $0xc0] sm:$0xff] %vm20_vm3, %v1750_v12  ;;  %46 = vst.msk [vmem:[#allocation2 + $0xc8] sm:$0xff] %vm20_vm3, %v1750_v12 }
  0x10   :  { %47 = vst.msk [vmem:[#allocation2 + $0xd0] sm:$0xff] %vm20_vm3, %v1750_v12  ;;  %48 = vst.msk [vmem:[#allocation2 + $0xd8] sm:$0xff] %vm20_vm3, %v1750_v12 }
  0x11   :  { %49 = vst.msk [vmem:[#allocation2 + $0xe0] sm:$0xff] %vm20_vm3, %v1750_v12  ;;  %50 = vst.msk [vmem:[#allocation2 + $0xe8] sm:$0xff] %vm20_vm3, %v1750_v12 }
  0x12   :  { %51 = vst.msk [vmem:[#allocation2 + $0xf0] sm:$0xff] %vm20_vm3, %v1750_v12  ;;  %52 = vst.msk [vmem:[#allocation2 + $0xf8] sm:$0xff] %vm20_vm3, %v1750_v12  ;;  %1623 = vmatmul.mubr.msk.bf16.gmra.mrb[4].mxu0 %vm388_vm2, %v1699_v13  ;;  %1655 = vmatmul.mubr.msk.bf16.gmra.mrb[4].mxu1 %vm388_vm2, %v1700_v14 }
  0x13   :  { %53 = vst.msk [vmem:[#allocation2 + $0x100] sm:$0xff] %vm20_vm3, %v1750_v12  ;;  %54 = vst.msk [vmem:[#allocation2 + $0x108] sm:$0xff] %vm20_vm3, %v1750_v12  ;;  %1626 = vmatprep.mubr.msk.bf16.mxu0 %vm388_vm2, %v1701_v15  ;;  %1658 = vmatprep.mubr.msk.bf16.mxu1 %vm388_vm2, %v1702_v16 }
  0x14   :  { %55 = vst.msk [vmem:[#allocation2 + $0x110] sm:$0xff] %vm20_vm3, %v1750_v12  ;;  %56 = vst.msk [vmem:[#allocation2 + $0x118] sm:$0xff] %vm20_vm3, %v1750_v12 }
  0x15   :  { %57 = vst.msk [vmem:[#allocation2 + $0x120] sm:$0xff] %vm20_vm3, %v1750_v12  ;;  %58 = vst.msk [vmem:[#allocation2 + $0x128] sm:$0xff] %vm20_vm3, %v1750_v12 }
  0x16   :  { %59 = vst.msk [vmem:[#allocation2 + $0x130] sm:$0xff] %vm20_vm3, %v1750_v12  ;;  %60 = vst.msk [vmem:[#allocation2 + $0x138] sm:$0xff] %vm20_vm3, %v1750_v12 }
  0x17   :  { %61 = vst.msk [vmem:[#allocation2 + $0x140] sm:$0xff] %vm20_vm3, %v1750_v12  ;;  %62 = vst.msk [vmem:[#allocation2 + $0x148] sm:$0xff] %vm20_vm3, %v1750_v12 }
  0x18   :  { %63 = vst.msk [vmem:[#allocation2 + $0x150] sm:$0xff] %vm20_vm3, %v1750_v12  ;;  %64 = vst.msk [vmem:[#allocation2 + $0x158] sm:$0xff] %vm20_vm3, %v1750_v12 }
  0x19   :  { %65 = vst.msk [vmem:[#allocation2 + $0x160] sm:$0xff] %vm20_vm3, %v1750_v12  ;;  %66 = vst.msk [vmem:[#allocation2 + $0x168] sm:$0xff] %vm20_vm3, %v1750_v12 }
  0x1a   :  { %67 = vst.msk [vmem:[#allocation2 + $0x170] sm:$0xff] %vm20_vm3, %v1750_v12  ;;  %68 = vst.msk [vmem:[#allocation2 + $0x178] sm:$0xff] %vm20_vm3, %v1750_v12  ;;  %1627 = vmatmul.mubr.msk.bf16.gmra.mrb[8].mxu0 %vm388_vm2, %v1703_v17  ;;  %1659 = vmatmul.mubr.msk.bf16.gmra.mrb[8].mxu1 %vm388_vm2, %v1704_v18 }
  0x1b   :  { %69 = vst.msk [vmem:[#allocation2 + $0x180] sm:$0xff] %vm20_vm3, %v1750_v12  ;;  %70 = vst.msk [vmem:[#allocation2 + $0x188] sm:$0xff] %vm20_vm3, %v1750_v12  ;;  %1630 = vmatprep.mubr.msk.bf16.mxu0 %vm388_vm2, %v1705_v19  ;;  %1662 = vmatprep.mubr.msk.bf16.mxu1 %vm388_vm2, %v1706_v20 }
  0x1c   :  { %71 = vst.msk [vmem:[#allocation2 + $0x190] sm:$0xff] %vm20_vm3, %v1750_v12  ;;  %72 = vst.msk [vmem:[#allocation2 + $0x198] sm:$0xff] %vm20_vm3, %v1750_v12 }
  0x1d   :  { %73 = vst.msk [vmem:[#allocation2 + $0x1a0] sm:$0xff] %vm20_vm3, %v1750_v12  ;;  %74 = vst.msk [vmem:[#allocation2 + $0x1a8] sm:$0xff] %vm20_vm3, %v1750_v12 }
  0x1e   :  { %75 = vst.msk [vmem:[#allocation2 + $0x1b0] sm:$0xff] %vm20_vm3, %v1750_v12  ;;  %76 = vst.msk [vmem:[#allocation2 + $0x1b8] sm:$0xff] %vm20_vm3, %v1750_v12 }
  0x1f   :  { %77 = vst.msk [vmem:[#allocation2 + $0x1c0] sm:$0xff] %vm20_vm3, %v1750_v12  ;;  %78 = vst.msk [vmem:[#allocation2 + $0x1c8] sm:$0xff] %vm20_vm3, %v1750_v12 }
  0x20   :  { %79 = vst.msk [vmem:[#allocation2 + $0x1d0] sm:$0xff] %vm20_vm3, %v1750_v12  ;;  %80 = vst.msk [vmem:[#allocation2 + $0x1d8] sm:$0xff] %vm20_vm3, %v1750_v12 }
  0x21   :  { %81 = vst.msk [vmem:[#allocation2 + $0x1e0] sm:$0xff] %vm20_vm3, %v1750_v12  ;;  %82 = vst.msk [vmem:[#allocation2 + $0x1e8] sm:$0xff] %vm20_vm3, %v1750_v12 }
  0x22   :  { %83 = vst.msk [vmem:[#allocation2 + $0x1f0] sm:$0xff] %vm20_vm3, %v1750_v12  ;;  %84 = vst.msk [vmem:[#allocation2 + $0x1f8] sm:$0xff] %vm20_vm3, %v1750_v12 }
  0x23   :  { %8 = vsyncpa [#allocation4], 0  ;;  %1631 = vmatmul.mubr.msk.bf16.gmra.mrb[12].mxu0 %vm388_vm2, %v1707_v21  ;;  %1663 = vmatmul.mubr.msk.bf16.gmra.mrb[12].mxu1 %vm388_vm2, %v1708_v22  ;;  %v1711_v25 = vld [vmem:[%s2257_s0 + $0x48] sm:$0xff]   ;;  %v1713_v27 = vld [vmem:[%s2257_s0 + $0x50] sm:$0xff]   ;;  %vm1304_vm4 = vcmask 519168  }
  0x24   :  { %1634 = vmatprep.mubr.msk.bf16.mxu0 %vm388_vm2, %v1709_v23  ;;  %1666 = vmatprep.mubr.msk.bf16.mxu1 %vm388_vm2, %v1710_v24  ;;  %v1712_v26 = vld [vmem:[%s2257_s0 + $0xc8] sm:$0xff]   ;;  %v1714_v28 = vld [vmem:[%s2257_s0 + $0xd0] sm:$0xff]   ;;  %v1715_v29 = vld [vmem:[%s2257_s0 + $0x58] sm:$0xff]  }
  0x25   :  { %v1716_v30 = vld [vmem:[%s2257_s0 + $0xd8] sm:$0xff]   ;;  %v1717_v31 = vld [vmem:[%s2257_s0 + $0x60] sm:$0xff]   ;;  %v1719_v33 = vld [vmem:[%s2257_s0 + $0x68] sm:$0xff]  }
  0x26   :  { %v1718_v32 = vld [vmem:[%s2257_s0 + $0xe0] sm:$0xff]   ;;  %v1720_v34 = vld [vmem:[%s2257_s0 + $0xe8] sm:$0xff]   ;;  %v1721_v35 = vld [vmem:[%s2257_s0 + $0x70] sm:$0xff]  }
  0x27   :  { %v1722_v36 = vld [vmem:[%s2257_s0 + $0xf0] sm:$0xff]   ;;  %v1723_v37 = vld [vmem:[%s2257_s0 + $0x78] sm:$0xff]   ;;  %v85_v41 = vld [vmem:[#allocation2] sm:$0xff] }
  0x28   :  { %v1724_v38 = vld [vmem:[%s2257_s0 + $0xf8] sm:$0xff]   ;;  %v87_v39 = vld [vmem:[#allocation2 + $0x10] sm:$0xff]  ;;  %v117_v42 = vld [vmem:[#allocation2 + $0x100] sm:$0xff] }
  0x29   :  { %v119_v40 = vld [vmem:[#allocation2 + $0x110] sm:$0xff]  ;;  %v88_v45 = vld [vmem:[#allocation2 + $0x18] sm:$0xff]  ;;  %v86_v51 = vld [vmem:[#allocation2 + $0x8] sm:$0xff] }
  0x2a   :  { %v120_v46 = vld [vmem:[#allocation2 + $0x118] sm:$0xff]  ;;  %v118_v52 = vld [vmem:[#allocation2 + $0x108] sm:$0xff]  ;;  %v91_v63 = vld [vmem:[#allocation2 + $0x30] sm:$0xff] }
  0x2b   :  { %1635 = vmatmul.mubr.msk.bf16.gmra.mrb[16].mxu0 %vm388_vm2, %v1711_v25  ;;  %1667 = vmatmul.mubr.msk.bf16.gmra.mrb[16].mxu1 %vm388_vm2, %v1712_v26  ;;  %v123_v0 = vld [vmem:[#allocation2 + $0x130] sm:$0xff]  ;;  %v89_v1 = vld [vmem:[#allocation2 + $0x20] sm:$0xff]  ;;  %v92_v6 = vld [vmem:[#allocation2 + $0x38] sm:$0xff] }
  0x2c   :  { %1638 = vmatprep.mubr.msk.bf16.mxu0 %vm388_vm2, %v1713_v27  ;;  %1670 = vmatprep.mubr.msk.bf16.mxu1 %vm388_vm2, %v1714_v28  ;;  %v121_v2 = vld [vmem:[#allocation2 + $0x120] sm:$0xff]  ;;  %v124_v7 = vld [vmem:[#allocation2 + $0x138] sm:$0xff]  ;;  %v90_v12 = vld [vmem:[#allocation2 + $0x28] sm:$0xff] }
  0x2d   :  { %v2059_v3 = vld [vmem:[%s2259_s2] ss:$0 sm:$0xff]  ;;  %v122_v13 = vld [vmem:[#allocation2 + $0x128] sm:$0xff]  ;;  %s1751_s2 = smov [#allocation3]  }
  0x2e   :  { %s1374_s24 = sshll.u32 %s1751_s2, 4  ;;  %s1375_s24 = int_to_ptr.vmem [resolvable:$true] %s1374_s24 }
  0x2f   :  { %s1725_s25 = scalar_lea.vmem %s1375_s24, 4096  ;;  %p1730_p1 = scmp.lt.s32.totalorder %s1375_s24, %s1375_s24 }
  0x30   :  { %p1726_p0 = scmp.ne.s32.totalorder %s1375_s24, %s1725_s25  ;;  %p1731_p2 = scmp.lt.s32.totalorder %s1725_s25, %s1725_s25 }
  0x32   :  { %p1732_p3 = por %p1731_p2, %p1730_p1 }
  0x33   :  { %1639 = vmatmul.mubr.msk.bf16.gmra.mrb[20].mxu0 %vm388_vm2, %v1715_v29  ;;  %1671 = vmatmul.mubr.msk.bf16.gmra.mrb[20].mxu1 %vm388_vm2, %v1716_v30 }
  0x34   :  { %1642 = vmatprep.mubr.msk.bf16.mxu0 %vm388_vm2, %v1717_v31  ;;  %1674 = vmatprep.mubr.msk.bf16.mxu1 %vm388_vm2, %v1718_v32  ;;  %p1733_p4 = pnand %p1732_p3, %p1726_p0 }
  0x3b   :  { %1643 = vmatmul.mubr.msk.bf16.gmra.mrb[24].mxu0 %vm388_vm2, %v1719_v33  ;;  %1675 = vmatmul.mubr.msk.bf16.gmra.mrb[24].mxu1 %vm388_vm2, %v1720_v34 }
  0x3c   :  { %1646 = vmatprep.mubr.msk.bf16.mxu0 %vm388_vm2, %v1721_v35  ;;  %1678 = vmatprep.mubr.msk.bf16.mxu1 %vm388_vm2, %v1722_v36 }
  0x43   :  { %1647 = vmatmul.mubr.msk.bf16.gmra.mrb[28].mxu0 %vm388_vm2, %v1723_v37  ;;  %1679 = vmatmul.mubr.msk.bf16.gmra.mrb[28].mxu1 %vm388_vm2, %v1724_v38 }
  0xdd   :  { %v1620_v43 = vpop.f32.mrb[0].mxu0  ;;  %v1652_v44 = vpop.f32.mrb[0].mxu1 }
  0xde   :  { %v783_v47 = vadd.f32 %v1620_v43, %v87_v39  ;;  %v815_v48 = vadd.f32 %v1652_v44, %v119_v40  ;;  %v526_v49 = vpop.f32.mrb[1].mxu0  ;;  %v654_v50 = vpop.f32.mrb[1].mxu1  ;;  %v95_v44 = vld [vmem:[#allocation2 + $0x50] sm:$0xff] }
  0xdf   :  { %v781_v53 = vadd.f32 %v526_v49, %v85_v41  ;;  %v813_v54 = vadd.f32 %v654_v50, %v117_v42  ;;  %v1621_v55 = vpop.f32.mrb[2].mxu0  ;;  %v1653_v56 = vpop.f32.mrb[2].mxu1  ;;  %v125_v49 = vld [vmem:[#allocation2 + $0x140] sm:$0xff] }
  0xe0   :  { %848 = vst.msk [vmem:[#allocation2 + $0x10] sm:$0xff] %vm20_vm3, %v783_v47  ;;  %880 = vst.msk [vmem:[#allocation2 + $0x110] sm:$0xff] %vm20_vm3, %v815_v48  ;;  %v784_v57 = vadd.f32 %v1621_v55, %v88_v45  ;;  %v816_v58 = vadd.f32 %v1653_v56, %v120_v46  ;;  %v529_v59 = vpop.f32.mrb[3].mxu0  ;;  %v657_v60 = vpop.f32.mrb[3].mxu1  ;;  %v127_v45 = vld [vmem:[#allocation2 + $0x150] sm:$0xff]  ;;  %v93_v48 = vld [vmem:[#allocation2 + $0x40] sm:$0xff] }
  0xe1   :  { %846 = vst.msk [vmem:[#allocation2] sm:$0xff] %vm20_vm3, %v781_v53  ;;  %878 = vst.msk [vmem:[#allocation2 + $0x100] sm:$0xff] %vm20_vm3, %v813_v54  ;;  %v782_v61 = vadd.f32 %v529_v59, %v86_v51  ;;  %v814_v62 = vadd.f32 %v657_v60, %v118_v52  ;;  %v96_v54 = vld [vmem:[#allocation2 + $0x58] sm:$0xff]  ;;  %v94_v60 = vld [vmem:[#allocation2 + $0x48] sm:$0xff] }
  0xe2   :  { %849 = vst.msk [vmem:[#allocation2 + $0x18] sm:$0xff] %vm20_vm3, %v784_v57  ;;  %881 = vst.msk [vmem:[#allocation2 + $0x118] sm:$0xff] %vm20_vm3, %v816_v58  ;;  %v128_v55 = vld [vmem:[#allocation2 + $0x158] sm:$0xff] }
  0xe3   :  { %847 = vst.msk [vmem:[#allocation2 + $0x8] sm:$0xff] %vm20_vm3, %v782_v61  ;;  %879 = vst.msk [vmem:[#allocation2 + $0x108] sm:$0xff] %vm20_vm3, %v814_v62  ;;  %v126_v61 = vld [vmem:[#allocation2 + $0x148] sm:$0xff] }
  0xe5   :  { %v1624_v4 = vpop.f32.mrb[4].mxu0  ;;  %v1656_v5 = vpop.f32.mrb[4].mxu1 }
  0xe6   :  { %v787_v8 = vadd.f32 %v1624_v4, %v91_v63  ;;  %v819_v9 = vadd.f32 %v1656_v5, %v123_v0  ;;  %v542_v10 = vpop.f32.mrb[5].mxu0  ;;  %v670_v11 = vpop.f32.mrb[5].mxu1 }
  0xe7   :  { %v915_v14 = vld [vmem:[#allocation2 + $0x10] sm:$0xff]  ;;  %v785_v16 = vadd.f32 %v542_v10, %v89_v1  ;;  %v817_v17 = vadd.f32 %v670_v11, %v121_v2  ;;  %v1625_v18 = vpop.f32.mrb[6].mxu0  ;;  %v1657_v19 = vpop.f32.mrb[6].mxu1 }
  0xe8   :  { %v947_v15 = vld [vmem:[#allocation2 + $0x110] sm:$0xff]  ;;  %v986_v20 = vadd.f32 %v2059_v3, %v915_v14  ;;  %v913_v22 = vld [vmem:[#allocation2] sm:$0xff]  ;;  %852 = vst.msk [vmem:[#allocation2 + $0x30] sm:$0xff] %vm20_vm3, %v787_v8  ;;  %884 = vst.msk [vmem:[#allocation2 + $0x130] sm:$0xff] %vm20_vm3, %v819_v9  ;;  %v788_v24 = vadd.f32 %v1625_v18, %v92_v6  ;;  %v820_v25 = vadd.f32 %v1657_v19, %v124_v7  ;;  %v545_v26 = vpop.f32.mrb[7].mxu0  ;;  %v673_v27 = vpop.f32.mrb[7].mxu1 }
  0xe9   :  { %v1018_v21 = vadd.f32 %v2059_v3, %v947_v15  ;;  %v945_v23 = vld [vmem:[#allocation2 + $0x100] sm:$0xff]  ;;  %v984_v28 = vadd.f32 %v2059_v3, %v913_v22  ;;  %v916_v30 = vld [vmem:[#allocation2 + $0x18] sm:$0xff]  ;;  %850 = vst.msk [vmem:[#allocation2 + $0x20] sm:$0xff] %vm20_vm3, %v785_v16  ;;  %882 = vst.msk [vmem:[#allocation2 + $0x120] sm:$0xff] %vm20_vm3, %v817_v17  ;;  %v786_v32 = vadd.f32 %v545_v26, %v90_v12 }
  0xea   :  { %v1016_v29 = vadd.f32 %v2059_v3, %v945_v23  ;;  %v948_v31 = vld [vmem:[#allocation2 + $0x118] sm:$0xff]  ;;  %v818_v33 = vadd.f32 %v673_v27, %v122_v13  ;;  %v1518_v34 = vpack.c.bf16 %v986_v20, %v986_v20  ;;  %v987_v36 = vadd.f32 %v2059_v3, %v916_v30  ;;  %v914_v38 = vld [vmem:[#allocation2 + $0x8] sm:$0xff]  ;;  %853 = vst.msk [vmem:[#allocation2 + $0x38] sm:$0xff] %vm20_vm3, %v788_v24  ;;  %v131_v30 = vld [vmem:[#allocation2 + $0x170] sm:$0xff] }
  0xeb   :  { %v1550_v35 = vpack.c.bf16 %v1018_v21, %v1018_v21  ;;  %v1019_v37 = vadd.f32 %v2059_v3, %v948_v31  ;;  %v946_v39 = vld [vmem:[#allocation2 + $0x108] sm:$0xff]  ;;  %885 = vst.msk [vmem:[#allocation2 + $0x138] sm:$0xff] %vm20_vm3, %v820_v25  ;;  %v1516_v40 = vpack.c.bf16 %v984_v28, %v984_v28  ;;  %v985_v42 = vadd.f32 %v2059_v3, %v914_v38 }
  0xec   :  { %v1548_v41 = vpack.c.bf16 %v1016_v29, %v1016_v29  ;;  %v1017_v43 = vadd.f32 %v2059_v3, %v946_v39  ;;  %851 = vst.msk [vmem:[#allocation2 + $0x28] sm:$0xff] %vm20_vm3, %v786_v32  ;;  %883 = vst.msk [vmem:[#allocation2 + $0x128] sm:$0xff] %vm20_vm3, %v818_v33  ;;  %v1519_v46 = vpack.c.bf16 %v987_v36, %v987_v36  ;;  %v99_v29 = vld [vmem:[#allocation2 + $0x70] sm:$0xff]  ;;  %v97_v33 = vld [vmem:[#allocation2 + $0x60] sm:$0xff] }
  0xed   :  { %1307 = vst.msk [vmem:[#allocation3 + $0x8] sm:$0xf] %vm1304_vm4, %v1518_v34  ;;  %1339 = vst.msk [vmem:[#allocation3 + $0x88] sm:$0xf] %vm1304_vm4, %v1550_v35  ;;  %v1551_v47 = vpack.c.bf16 %v1019_v37, %v1019_v37  ;;  %v1517_v50 = vpack.c.bf16 %v985_v42, %v985_v42  ;;  %v1628_v52 = vpop.f32.mrb[8].mxu0  ;;  %v1660_v53 = vpop.f32.mrb[8].mxu1 }
  0xee   :  { %1305 = vst.msk [vmem:[#allocation3] sm:$0xf] %vm1304_vm4, %v1516_v40  ;;  %1337 = vst.msk [vmem:[#allocation3 + $0x80] sm:$0xf] %vm1304_vm4, %v1548_v41  ;;  %v1549_v51 = vpack.c.bf16 %v1017_v43, %v1017_v43  ;;  %v791_v56 = vadd.f32 %v1628_v52, %v95_v44  ;;  %v823_v57 = vadd.f32 %v1660_v53, %v127_v45  ;;  %v558_v58 = vpop.f32.mrb[9].mxu0  ;;  %v686_v59 = vpop.f32.mrb[9].mxu1 }
  0xef   :  { %1308 = vst.msk [vmem:[#allocation3 + $0xc] sm:$0xf] %vm1304_vm4, %v1519_v46  ;;  %1340 = vst.msk [vmem:[#allocation3 + $0x8c] sm:$0xf] %vm1304_vm4, %v1551_v47  ;;  %v919_v62 = vld [vmem:[#allocation2 + $0x30] sm:$0xff]  ;;  %v789_v0 = vadd.f32 %v558_v58, %v93_v48  ;;  %v821_v1 = vadd.f32 %v686_v59, %v125_v49  ;;  %v1629_v2 = vpop.f32.mrb[10].mxu0 }
  0xf0   :  { %1306 = vst.msk [vmem:[#allocation3 + $0x4] sm:$0xf] %vm1304_vm4, %v1517_v50  ;;  %1338 = vst.msk [vmem:[#allocation3 + $0x84] sm:$0xf] %vm1304_vm4, %v1549_v51  ;;  %v951_v63 = vld [vmem:[#allocation2 + $0x130] sm:$0xff]  ;;  %v1661_v4 = vpop.f32.mrb[10].mxu1  ;;  %v990_v5 = vadd.f32 %v2059_v3, %v919_v62  ;;  %v792_v9 = vadd.f32 %v1629_v2, %v96_v54 }
  0xf1   :  { %v1022_v6 = vadd.f32 %v2059_v3, %v951_v63  ;;  %v917_v7 = vld [vmem:[#allocation2 + $0x20] sm:$0xff]  ;;  %856 = vst.msk [vmem:[#allocation2 + $0x50] sm:$0xff] %vm20_vm3, %v791_v56  ;;  %888 = vst.msk [vmem:[#allocation2 + $0x150] sm:$0xff] %vm20_vm3, %v823_v57  ;;  %v824_v10 = vadd.f32 %v1661_v4, %v128_v55  ;;  %v561_v11 = vpop.f32.mrb[11].mxu0  ;;  %v689_v12 = vpop.f32.mrb[11].mxu1  ;;  %v920_v15 = vld [vmem:[#allocation2 + $0x38] sm:$0xff] }
  0xf2   :  { %v949_v8 = vld [vmem:[#allocation2 + $0x120] sm:$0xff]  ;;  %v988_v13 = vadd.f32 %v2059_v3, %v917_v7  ;;  %v952_v16 = vld [vmem:[#allocation2 + $0x138] sm:$0xff]  ;;  %854 = vst.msk [vmem:[#allocation2 + $0x40] sm:$0xff] %vm20_vm3, %v789_v0  ;;  %886 = vst.msk [vmem:[#allocation2 + $0x140] sm:$0xff] %vm20_vm3, %v821_v1  ;;  %v790_v17 = vadd.f32 %v561_v11, %v94_v60  ;;  %v822_v18 = vadd.f32 %v689_v12, %v126_v61 }
  0xf3   :  { %v1020_v14 = vadd.f32 %v2059_v3, %v949_v8  ;;  %v1522_v19 = vpack.c.bf16 %v990_v5, %v990_v5  ;;  %v1554_v20 = vpack.c.bf16 %v1022_v6, %v1022_v6  ;;  %v991_v21 = vadd.f32 %v2059_v3, %v920_v15  ;;  %v918_v23 = vld [vmem:[#allocation2 + $0x28] sm:$0xff]  ;;  %857 = vst.msk [vmem:[#allocation2 + $0x58] sm:$0xff] %vm20_vm3, %v792_v9  ;;  %v129_v34 = vld [vmem:[#allocation2 + $0x160] sm:$0xff]  ;;  %v100_v39 = vld [vmem:[#allocation2 + $0x78] sm:$0xff] }
  0xf4   :  { %v1023_v22 = vadd.f32 %v2059_v3, %v952_v16  ;;  %v950_v24 = vld [vmem:[#allocation2 + $0x128] sm:$0xff]  ;;  %889 = vst.msk [vmem:[#allocation2 + $0x158] sm:$0xff] %vm20_vm3, %v824_v10  ;;  %v1520_v25 = vpack.c.bf16 %v988_v13, %v988_v13  ;;  %v989_v27 = vadd.f32 %v2059_v3, %v918_v23  ;;  %855 = vst.msk [vmem:[#allocation2 + $0x48] sm:$0xff] %vm20_vm3, %v790_v17  ;;  %v132_v40 = vld [vmem:[#allocation2 + $0x178] sm:$0xff] }
  0xf5   :  { %v1552_v26 = vpack.c.bf16 %v1020_v14, %v1020_v14  ;;  %v1021_v28 = vadd.f32 %v2059_v3, %v950_v24  ;;  %887 = vst.msk [vmem:[#allocation2 + $0x148] sm:$0xff] %vm20_vm3, %v822_v18  ;;  %v1523_v31 = vpack.c.bf16 %v991_v21, %v991_v21  ;;  %v98_v45 = vld [vmem:[#allocation2 + $0x68] sm:$0xff]  ;;  %v103_v14 = vld [vmem:[#allocation2 + $0x90] sm:$0xff]  ;;  %v101_v18 = vld [vmem:[#allocation2 + $0x80] sm:$0xff] }
  0xf6   :  { %1311 = vst.msk [vmem:[#allocation3 + $0x18] sm:$0xf] %vm1304_vm4, %v1522_v19  ;;  %1343 = vst.msk [vmem:[#allocation3 + $0x98] sm:$0xf] %vm1304_vm4, %v1554_v20  ;;  %v1555_v32 = vpack.c.bf16 %v1023_v22, %v1023_v22  ;;  %v1521_v35 = vpack.c.bf16 %v989_v27, %v989_v27  ;;  %v1632_v37 = vpop.f32.mrb[12].mxu0  ;;  %v1664_v38 = vpop.f32.mrb[12].mxu1 }
  0xf7   :  { %1309 = vst.msk [vmem:[#allocation3 + $0x10] sm:$0xf] %vm1304_vm4, %v1520_v25  ;;  %1341 = vst.msk [vmem:[#allocation3 + $0x90] sm:$0xf] %vm1304_vm4, %v1552_v26  ;;  %v1553_v36 = vpack.c.bf16 %v1021_v28, %v1021_v28  ;;  %v795_v41 = vadd.f32 %v1632_v37, %v99_v29  ;;  %v827_v42 = vadd.f32 %v1664_v38, %v131_v30  ;;  %v574_v43 = vpop.f32.mrb[13].mxu0  ;;  %v702_v44 = vpop.f32.mrb[13].mxu1 }
  0xf8   :  { %1312 = vst.msk [vmem:[#allocation3 + $0x1c] sm:$0xf] %vm1304_vm4, %v1523_v31  ;;  %1344 = vst.msk [vmem:[#allocation3 + $0x9c] sm:$0xf] %vm1304_vm4, %v1555_v32  ;;  %v130_v46 = vld [vmem:[#allocation2 + $0x168] sm:$0xff]  ;;  %v923_v47 = vld [vmem:[#allocation2 + $0x50] sm:$0xff]  ;;  %v793_v49 = vadd.f32 %v574_v43, %v97_v33  ;;  %v825_v50 = vadd.f32 %v702_v44, %v129_v34 }
  0xf9   :  { %1310 = vst.msk [vmem:[#allocation3 + $0x14] sm:$0xf] %vm1304_vm4, %v1521_v35  ;;  %1342 = vst.msk [vmem:[#allocation3 + $0x94] sm:$0xf] %vm1304_vm4, %v1553_v36  ;;  %v955_v48 = vld [vmem:[#allocation2 + $0x150] sm:$0xff]  ;;  %v1633_v51 = vpop.f32.mrb[14].mxu0  ;;  %v994_v53 = vadd.f32 %v2059_v3, %v923_v47 }
  0xfa   :  { %v1665_v52 = vpop.f32.mrb[14].mxu1  ;;  %v1026_v54 = vadd.f32 %v2059_v3, %v955_v48  ;;  %v921_v55 = vld [vmem:[#allocation2 + $0x40] sm:$0xff]  ;;  %860 = vst.msk [vmem:[#allocation2 + $0x70] sm:$0xff] %vm20_vm3, %v795_v41  ;;  %892 = vst.msk [vmem:[#allocation2 + $0x170] sm:$0xff] %vm20_vm3, %v827_v42  ;;  %v796_v57 = vadd.f32 %v1633_v51, %v100_v39  ;;  %v577_v59 = vpop.f32.mrb[15].mxu0  ;;  %v924_v63 = vld [vmem:[#allocation2 + $0x58] sm:$0xff] }
  0xfb   :  { %v953_v56 = vld [vmem:[#allocation2 + $0x140] sm:$0xff]  ;;  %v828_v58 = vadd.f32 %v1665_v52, %v132_v40  ;;  %v705_v60 = vpop.f32.mrb[15].mxu1  ;;  %v992_v61 = vadd.f32 %v2059_v3, %v921_v55  ;;  %v956_v0 = vld [vmem:[#allocation2 + $0x158] sm:$0xff]  ;;  %858 = vst.msk [vmem:[#allocation2 + $0x60] sm:$0xff] %vm20_vm3, %v793_v49  ;;  %890 = vst.msk [vmem:[#allocation2 + $0x160] sm:$0xff] %vm20_vm3, %v825_v50  ;;  %v794_v1 = vadd.f32 %v577_v59, %v98_v45 }
  0xfc   :  { %v1024_v62 = vadd.f32 %v2059_v3, %v953_v56  ;;  %v826_v2 = vadd.f32 %v705_v60, %v130_v46  ;;  %v1526_v4 = vpack.c.bf16 %v994_v53, %v994_v53  ;;  %v1558_v5 = vpack.c.bf16 %v1026_v54, %v1026_v54  ;;  %v922_v8 = vld [vmem:[#allocation2 + $0x48] sm:$0xff]  ;;  %861 = vst.msk [vmem:[#allocation2 + $0x78] sm:$0xff] %vm20_vm3, %v796_v57  ;;  %v135_v15 = vld [vmem:[#allocation2 + $0x190] sm:$0xff]  ;;  %v133_v19 = vld [vmem:[#allocation2 + $0x180] sm:$0xff] }
  0xfd   :  { %v995_v6 = vadd.f32 %v2059_v3, %v924_v63  ;;  %v1027_v7 = vadd.f32 %v2059_v3, %v956_v0  ;;  %v954_v9 = vld [vmem:[#allocation2 + $0x148] sm:$0xff]  ;;  %893 = vst.msk [vmem:[#allocation2 + $0x178] sm:$0xff] %vm20_vm3, %v828_v58  ;;  %v1524_v10 = vpack.c.bf16 %v992_v61, %v992_v61  ;;  %v993_v12 = vadd.f32 %v2059_v3, %v922_v8  ;;  %v104_v24 = vld [vmem:[#allocation2 + $0x98] sm:$0xff]  ;;  %v139_v63 = vld [vmem:[#allocation2 + $0x1b0] sm:$0xff] }
  0xfe   :  { %v1556_v11 = vpack.c.bf16 %v1024_v62, %v1024_v62  ;;  %v1025_v13 = vadd.f32 %v2059_v3, %v954_v9  ;;  %859 = vst.msk [vmem:[#allocation2 + $0x68] sm:$0xff] %vm20_vm3, %v794_v1  ;;  %891 = vst.msk [vmem:[#allocation2 + $0x168] sm:$0xff] %vm20_vm3, %v826_v2  ;;  %v1636_v22 = vpop.f32.mrb[16].mxu0  ;;  %v1668_v23 = vpop.f32.mrb[16].mxu1  ;;  %v136_v25 = vld [vmem:[#allocation2 + $0x198] sm:$0xff]  ;;  %v102_v30 = vld [vmem:[#allocation2 + $0x88] sm:$0xff] }
  0xff   :  { %1315 = vst.msk [vmem:[#allocation3 + $0x28] sm:$0xf] %vm1304_vm4, %v1526_v4  ;;  %1347 = vst.msk [vmem:[#allocation3 + $0xa8] sm:$0xf] %vm1304_vm4, %v1558_v5  ;;  %v1527_v16 = vpack.c.bf16 %v995_v6, %v995_v6  ;;  %v1559_v17 = vpack.c.bf16 %v1027_v7, %v1027_v7  ;;  %v1525_v20 = vpack.c.bf16 %v993_v12, %v993_v12  ;;  %v590_v28 = vpop.f32.mrb[17].mxu0  ;;  %v718_v29 = vpop.f32.mrb[17].mxu1 }
 0x100   :  { %1313 = vst.msk [vmem:[#allocation3 + $0x20] sm:$0xf] %vm1304_vm4, %v1524_v10  ;;  %1345 = vst.msk [vmem:[#allocation3 + $0xa0] sm:$0xf] %vm1304_vm4, %v1556_v11  ;;  %v1557_v21 = vpack.c.bf16 %v1025_v13, %v1025_v13  ;;  %v799_v26 = vadd.f32 %v1636_v22, %v103_v14  ;;  %v831_v27 = vadd.f32 %v1668_v23, %v135_v15  ;;  %v134_v31 = vld [vmem:[#allocation2 + $0x188] sm:$0xff]  ;;  %v1637_v36 = vpop.f32.mrb[18].mxu0 }
 0x101   :  { %1316 = vst.msk [vmem:[#allocation3 + $0x2c] sm:$0xf] %vm1304_vm4, %v1527_v16  ;;  %1348 = vst.msk [vmem:[#allocation3 + $0xac] sm:$0xf] %vm1304_vm4, %v1559_v17  ;;  %v927_v32 = vld [vmem:[#allocation2 + $0x70] sm:$0xff]  ;;  %v797_v34 = vadd.f32 %v590_v28, %v101_v18  ;;  %v829_v35 = vadd.f32 %v718_v29, %v133_v19  ;;  %v1669_v37 = vpop.f32.mrb[18].mxu1  ;;  %v800_v42 = vadd.f32 %v1637_v36, %v104_v24 }
 0x102   :  { %1314 = vst.msk [vmem:[#allocation3 + $0x24] sm:$0xf] %vm1304_vm4, %v1525_v20  ;;  %1346 = vst.msk [vmem:[#allocation3 + $0xa4] sm:$0xf] %vm1304_vm4, %v1557_v21  ;;  %v959_v33 = vld [vmem:[#allocation2 + $0x170] sm:$0xff]  ;;  %v998_v38 = vadd.f32 %v2059_v3, %v927_v32  ;;  %v925_v40 = vld [vmem:[#allocation2 + $0x60] sm:$0xff]  ;;  %v832_v43 = vadd.f32 %v1669_v37, %v136_v25 }
 0x103   :  { %v1030_v39 = vadd.f32 %v2059_v3, %v959_v33  ;;  %v957_v41 = vld [vmem:[#allocation2 + $0x160] sm:$0xff]  ;;  %864 = vst.msk [vmem:[#allocation2 + $0x90] sm:$0xff] %vm20_vm3, %v799_v26  ;;  %896 = vst.msk [vmem:[#allocation2 + $0x190] sm:$0xff] %vm20_vm3, %v831_v27  ;;  %v593_v44 = vpop.f32.mrb[19].mxu0  ;;  %v721_v45 = vpop.f32.mrb[19].mxu1  ;;  %v996_v46 = vadd.f32 %v2059_v3, %v925_v40  ;;  %v928_v48 = vld [vmem:[#allocation2 + $0x78] sm:$0xff] }
 0x104   :  { %v1028_v47 = vadd.f32 %v2059_v3, %v957_v41  ;;  %v960_v49 = vld [vmem:[#allocation2 + $0x178] sm:$0xff]  ;;  %862 = vst.msk [vmem:[#allocation2 + $0x80] sm:$0xff] %vm20_vm3, %v797_v34  ;;  %894 = vst.msk [vmem:[#allocation2 + $0x180] sm:$0xff] %vm20_vm3, %v829_v35  ;;  %v798_v50 = vadd.f32 %v593_v44, %v102_v30  ;;  %v830_v51 = vadd.f32 %v721_v45, %v134_v31  ;;  %v107_v62 = vld [vmem:[#allocation2 + $0xb0] sm:$0xff] }
 0x105   :  { %v1530_v52 = vpack.c.bf16 %v998_v38, %v998_v38  ;;  %v1562_v53 = vpack.c.bf16 %v1030_v39, %v1030_v39  ;;  %v999_v54 = vadd.f32 %v2059_v3, %v928_v48  ;;  %v1031_v55 = vadd.f32 %v2059_v3, %v960_v49  ;;  %v926_v56 = vld [vmem:[#allocation2 + $0x68] sm:$0xff]  ;;  %865 = vst.msk [vmem:[#allocation2 + $0x98] sm:$0xff] %vm20_vm3, %v800_v42  ;;  %v105_v2 = vld [vmem:[#allocation2 + $0xa0] sm:$0xff]  ;;  %v108_v9 = vld [vmem:[#allocation2 + $0xb8] sm:$0xff] }
 0x106   :  { %v958_v57 = vld [vmem:[#allocation2 + $0x168] sm:$0xff]  ;;  %897 = vst.msk [vmem:[#allocation2 + $0x198] sm:$0xff] %vm20_vm3, %v832_v43  ;;  %v1528_v58 = vpack.c.bf16 %v996_v46, %v996_v46  ;;  %v1560_v59 = vpack.c.bf16 %v1028_v47, %v1028_v47  ;;  %v997_v60 = vadd.f32 %v2059_v3, %v926_v56  ;;  %863 = vst.msk [vmem:[#allocation2 + $0x88] sm:$0xff] %vm20_vm3, %v798_v50  ;;  %v137_v4 = vld [vmem:[#allocation2 + $0x1a0] sm:$0xff]  ;;  %v1640_v7 = vpop.f32.mrb[20].mxu0  ;;  %v1672_v8 = vpop.f32.mrb[20].mxu1 }
 0x107   :  { %v1029_v61 = vadd.f32 %v2059_v3, %v958_v57  ;;  %895 = vst.msk [vmem:[#allocation2 + $0x188] sm:$0xff] %vm20_vm3, %v830_v51  ;;  %v1531_v0 = vpack.c.bf16 %v999_v54, %v999_v54  ;;  %v1563_v1 = vpack.c.bf16 %v1031_v55, %v1031_v55  ;;  %v140_v10 = vld [vmem:[#allocation2 + $0x1b8] sm:$0xff]  ;;  %v803_v11 = vadd.f32 %v1640_v7, %v107_v62  ;;  %v606_v13 = vpop.f32.mrb[21].mxu0  ;;  %v734_v14 = vpop.f32.mrb[21].mxu1  ;;  %v106_v15 = vld [vmem:[#allocation2 + $0xa8] sm:$0xff]  ;;  %v111_v47 = vld [vmem:[#allocation2 + $0xd0] sm:$0xff] }
 0x108   :  { %1319 = vst.msk [vmem:[#allocation3 + $0x38] sm:$0xf] %vm1304_vm4, %v1530_v52  ;;  %1351 = vst.msk [vmem:[#allocation3 + $0xb8] sm:$0xf] %vm1304_vm4, %v1562_v53  ;;  %v1529_v5 = vpack.c.bf16 %v997_v60, %v997_v60  ;;  %v835_v12 = vadd.f32 %v1672_v8, %v139_v63  ;;  %v138_v16 = vld [vmem:[#allocation2 + $0x1a8] sm:$0xff]  ;;  %v801_v19 = vadd.f32 %v606_v13, %v105_v2  ;;  %v1641_v21 = vpop.f32.mrb[22].mxu0 }
 0x109   :  { %1317 = vst.msk [vmem:[#allocation3 + $0x30] sm:$0xf] %vm1304_vm4, %v1528_v58  ;;  %1349 = vst.msk [vmem:[#allocation3 + $0xb0] sm:$0xf] %vm1304_vm4, %v1560_v59  ;;  %v1561_v6 = vpack.c.bf16 %v1029_v61, %v1029_v61  ;;  %v833_v20 = vadd.f32 %v734_v14, %v137_v4  ;;  %v1673_v22 = vpop.f32.mrb[22].mxu1  ;;  %v804_v27 = vadd.f32 %v1641_v21, %v108_v9  ;;  %v609_v29 = vpop.f32.mrb[23].mxu0 }
 0x10a   :  { %1320 = vst.msk [vmem:[#allocation3 + $0x3c] sm:$0xf] %vm1304_vm4, %v1531_v0  ;;  %1352 = vst.msk [vmem:[#allocation3 + $0xbc] sm:$0xf] %vm1304_vm4, %v1563_v1  ;;  %v931_v17 = vld [vmem:[#allocation2 + $0x90] sm:$0xff]  ;;  %v836_v28 = vadd.f32 %v1673_v22, %v140_v10  ;;  %v737_v30 = vpop.f32.mrb[23].mxu1  ;;  %v802_v35 = vadd.f32 %v609_v29, %v106_v15 }
 0x10b   :  { %1318 = vst.msk [vmem:[#allocation3 + $0x34] sm:$0xf] %vm1304_vm4, %v1529_v5  ;;  %1350 = vst.msk [vmem:[#allocation3 + $0xb4] sm:$0xf] %vm1304_vm4, %v1561_v6  ;;  %v963_v18 = vld [vmem:[#allocation2 + $0x190] sm:$0xff]  ;;  %v1002_v23 = vadd.f32 %v2059_v3, %v931_v17  ;;  %v929_v25 = vld [vmem:[#allocation2 + $0x80] sm:$0xff]  ;;  %v834_v36 = vadd.f32 %v737_v30, %v138_v16 }
 0x10c   :  { %v1034_v24 = vadd.f32 %v2059_v3, %v963_v18  ;;  %v961_v26 = vld [vmem:[#allocation2 + $0x180] sm:$0xff]  ;;  %868 = vst.msk [vmem:[#allocation2 + $0xb0] sm:$0xff] %vm20_vm3, %v803_v11  ;;  %900 = vst.msk [vmem:[#allocation2 + $0x1b0] sm:$0xff] %vm20_vm3, %v835_v12  ;;  %v1000_v31 = vadd.f32 %v2059_v3, %v929_v25  ;;  %v932_v33 = vld [vmem:[#allocation2 + $0x98] sm:$0xff] }
 0x10d   :  { %v1032_v32 = vadd.f32 %v2059_v3, %v961_v26  ;;  %v964_v34 = vld [vmem:[#allocation2 + $0x198] sm:$0xff]  ;;  %866 = vst.msk [vmem:[#allocation2 + $0xa0] sm:$0xff] %vm20_vm3, %v801_v19  ;;  %898 = vst.msk [vmem:[#allocation2 + $0x1a0] sm:$0xff] %vm20_vm3, %v833_v20  ;;  %v1534_v37 = vpack.c.bf16 %v1002_v23, %v1002_v23  ;;  %v1003_v39 = vadd.f32 %v2059_v3, %v932_v33  ;;  %v930_v41 = vld [vmem:[#allocation2 + $0x88] sm:$0xff] }
 0x10e   :  { %v1566_v38 = vpack.c.bf16 %v1034_v24, %v1034_v24  ;;  %v1035_v40 = vadd.f32 %v2059_v3, %v964_v34  ;;  %v962_v42 = vld [vmem:[#allocation2 + $0x188] sm:$0xff]  ;;  %869 = vst.msk [vmem:[#allocation2 + $0xb8] sm:$0xff] %vm20_vm3, %v804_v27  ;;  %901 = vst.msk [vmem:[#allocation2 + $0x1b8] sm:$0xff] %vm20_vm3, %v836_v28  ;;  %v1532_v43 = vpack.c.bf16 %v1000_v31, %v1000_v31  ;;  %v143_v48 = vld [vmem:[#allocation2 + $0x1d0] sm:$0xff]  ;;  %v1644_v55 = vpop.f32.mrb[24].mxu0  ;;  %v1676_v56 = vpop.f32.mrb[24].mxu1 }
 0x10f   :  { %v1564_v44 = vpack.c.bf16 %v1032_v32, %v1032_v32  ;;  %v1001_v45 = vadd.f32 %v2059_v3, %v930_v41  ;;  %v1033_v46 = vadd.f32 %v2059_v3, %v962_v42  ;;  %867 = vst.msk [vmem:[#allocation2 + $0xa8] sm:$0xff] %vm20_vm3, %v802_v35  ;;  %899 = vst.msk [vmem:[#allocation2 + $0x1a8] sm:$0xff] %vm20_vm3, %v834_v36  ;;  %v109_v51 = vld [vmem:[#allocation2 + $0xc0] sm:$0xff]  ;;  %v112_v57 = vld [vmem:[#allocation2 + $0xd8] sm:$0xff]  ;;  %v622_v61 = vpop.f32.mrb[25].mxu0  ;;  %v750_v62 = vpop.f32.mrb[25].mxu1 }
 0x110   :  { %1323 = vst.msk [vmem:[#allocation3 + $0x48] sm:$0xf] %vm1304_vm4, %v1534_v37  ;;  %1355 = vst.msk [vmem:[#allocation3 + $0xc8] sm:$0xf] %vm1304_vm4, %v1566_v38  ;;  %v1535_v49 = vpack.c.bf16 %v1003_v39, %v1003_v39  ;;  %v1567_v50 = vpack.c.bf16 %v1035_v40, %v1035_v40  ;;  %v141_v52 = vld [vmem:[#allocation2 + $0x1c0] sm:$0xff]  ;;  %v144_v58 = vld [vmem:[#allocation2 + $0x1d8] sm:$0xff]  ;;  %v807_v59 = vadd.f32 %v1644_v55, %v111_v47 }
 0x111   :  { %1321 = vst.msk [vmem:[#allocation3 + $0x40] sm:$0xf] %vm1304_vm4, %v1532_v43  ;;  %1353 = vst.msk [vmem:[#allocation3 + $0xc0] sm:$0xf] %vm1304_vm4, %v1564_v44  ;;  %v1533_v53 = vpack.c.bf16 %v1001_v45, %v1001_v45  ;;  %v1565_v54 = vpack.c.bf16 %v1033_v46, %v1033_v46  ;;  %v839_v60 = vadd.f32 %v1676_v56, %v143_v48  ;;  %v110_v63 = vld [vmem:[#allocation2 + $0xc8] sm:$0xff]  ;;  %v1645_v6 = vpop.f32.mrb[26].mxu0 }
 0x112   :  { %1324 = vst.msk [vmem:[#allocation3 + $0x4c] sm:$0xf] %vm1304_vm4, %v1535_v49  ;;  %1356 = vst.msk [vmem:[#allocation3 + $0xcc] sm:$0xf] %vm1304_vm4, %v1567_v50  ;;  %v142_v0 = vld [vmem:[#allocation2 + $0x1c8] sm:$0xff]  ;;  %v805_v4 = vadd.f32 %v622_v61, %v109_v51  ;;  %v837_v5 = vadd.f32 %v750_v62, %v141_v52  ;;  %v1677_v7 = vpop.f32.mrb[26].mxu1  ;;  %v808_v12 = vadd.f32 %v1645_v6, %v112_v57 }
 0x113   :  { %1322 = vst.msk [vmem:[#allocation3 + $0x44] sm:$0xf] %vm1304_vm4, %v1533_v53  ;;  %1354 = vst.msk [vmem:[#allocation3 + $0xc4] sm:$0xf] %vm1304_vm4, %v1565_v54  ;;  %v935_v1 = vld [vmem:[#allocation2 + $0xb0] sm:$0xff]  ;;  %v840_v13 = vadd.f32 %v1677_v7, %v144_v58  ;;  %v625_v14 = vpop.f32.mrb[27].mxu0 }
 0x114   :  { %v967_v2 = vld [vmem:[#allocation2 + $0x1b0] sm:$0xff]  ;;  %v1006_v8 = vadd.f32 %v2059_v3, %v935_v1  ;;  %v933_v10 = vld [vmem:[#allocation2 + $0xa0] sm:$0xff]  ;;  %872 = vst.msk [vmem:[#allocation2 + $0xd0] sm:$0xff] %vm20_vm3, %v807_v59  ;;  %904 = vst.msk [vmem:[#allocation2 + $0x1d0] sm:$0xff] %vm20_vm3, %v839_v60  ;;  %v753_v15 = vpop.f32.mrb[27].mxu1  ;;  %v806_v20 = vadd.f32 %v625_v14, %v110_v63 }
 0x115   :  { %v1038_v9 = vadd.f32 %v2059_v3, %v967_v2  ;;  %v965_v11 = vld [vmem:[#allocation2 + $0x1a0] sm:$0xff]  ;;  %v1004_v16 = vadd.f32 %v2059_v3, %v933_v10  ;;  %v936_v18 = vld [vmem:[#allocation2 + $0xb8] sm:$0xff]  ;;  %870 = vst.msk [vmem:[#allocation2 + $0xc0] sm:$0xff] %vm20_vm3, %v805_v4  ;;  %902 = vst.msk [vmem:[#allocation2 + $0x1c0] sm:$0xff] %vm20_vm3, %v837_v5  ;;  %v838_v21 = vadd.f32 %v753_v15, %v142_v0 }
 0x116   :  { %v1036_v17 = vadd.f32 %v2059_v3, %v965_v11  ;;  %v968_v19 = vld [vmem:[#allocation2 + $0x1b8] sm:$0xff]  ;;  %v1538_v22 = vpack.c.bf16 %v1006_v8, %v1006_v8  ;;  %v1007_v24 = vadd.f32 %v2059_v3, %v936_v18  ;;  %v934_v26 = vld [vmem:[#allocation2 + $0xa8] sm:$0xff]  ;;  %873 = vst.msk [vmem:[#allocation2 + $0xd8] sm:$0xff] %vm20_vm3, %v808_v12  ;;  %905 = vst.msk [vmem:[#allocation2 + $0x1d8] sm:$0xff] %vm20_vm3, %v840_v13  ;;  %v1648_v40 = vpop.f32.mrb[28].mxu0  ;;  %v1680_v41 = vpop.f32.mrb[28].mxu1 }
 0x117   :  { %v1570_v23 = vpack.c.bf16 %v1038_v9, %v1038_v9  ;;  %v1039_v25 = vadd.f32 %v2059_v3, %v968_v19  ;;  %v966_v27 = vld [vmem:[#allocation2 + $0x1a8] sm:$0xff]  ;;  %v1536_v28 = vpack.c.bf16 %v1004_v16, %v1004_v16  ;;  %v1005_v30 = vadd.f32 %v2059_v3, %v934_v26  ;;  %871 = vst.msk [vmem:[#allocation2 + $0xc8] sm:$0xff] %vm20_vm3, %v806_v20  ;;  %v115_v32 = vld [vmem:[#allocation2 + $0xf0] sm:$0xff]  ;;  %v113_v36 = vld [vmem:[#allocation2 + $0xe0] sm:$0xff]  ;;  %v638_v46 = vpop.f32.mrb[29].mxu0  ;;  %v766_v47 = vpop.f32.mrb[29].mxu1 }
 0x118   :  { %v1568_v29 = vpack.c.bf16 %v1036_v17, %v1036_v17  ;;  %v1037_v31 = vadd.f32 %v2059_v3, %v966_v27  ;;  %903 = vst.msk [vmem:[#allocation2 + $0x1c8] sm:$0xff] %vm20_vm3, %v838_v21  ;;  %v147_v33 = vld [vmem:[#allocation2 + $0x1f0] sm:$0xff]  ;;  %v1539_v34 = vpack.c.bf16 %v1007_v24, %v1007_v24  ;;  %v145_v37 = vld [vmem:[#allocation2 + $0x1e0] sm:$0xff]  ;;  %v116_v42 = vld [vmem:[#allocation2 + $0xf8] sm:$0xff]  ;;  %v811_v44 = vadd.f32 %v1648_v40, %v115_v32  ;;  %v1649_v54 = vpop.f32.mrb[30].mxu0  ;;  %v1681_v55 = vpop.f32.mrb[30].mxu1 }
 0x119   :  { %1327 = vst.msk [vmem:[#allocation3 + $0x58] sm:$0xf] %vm1304_vm4, %v1538_v22  ;;  %1359 = vst.msk [vmem:[#allocation3 + $0xd8] sm:$0xf] %vm1304_vm4, %v1570_v23  ;;  %v1571_v35 = vpack.c.bf16 %v1039_v25, %v1039_v25  ;;  %v1537_v38 = vpack.c.bf16 %v1005_v30, %v1005_v30  ;;  %v148_v43 = vld [vmem:[#allocation2 + $0x1f8] sm:$0xff]  ;;  %v843_v45 = vadd.f32 %v1680_v41, %v147_v33  ;;  %v114_v48 = vld [vmem:[#allocation2 + $0xe8] sm:$0xff] }
 0x11a   :  { %1325 = vst.msk [vmem:[#allocation3 + $0x50] sm:$0xf] %vm1304_vm4, %v1536_v28  ;;  %1357 = vst.msk [vmem:[#allocation3 + $0xd0] sm:$0xf] %vm1304_vm4, %v1568_v29  ;;  %v1569_v39 = vpack.c.bf16 %v1037_v31, %v1037_v31  ;;  %v146_v49 = vld [vmem:[#allocation2 + $0x1e8] sm:$0xff]  ;;  %v809_v52 = vadd.f32 %v638_v46, %v113_v36  ;;  %v841_v53 = vadd.f32 %v766_v47, %v145_v37  ;;  %v641_v62 = vpop.f32.mrb[31].mxu0 }
 0x11b   :  { %1328 = vst.msk [vmem:[#allocation3 + $0x5c] sm:$0xf] %vm1304_vm4, %v1539_v34  ;;  %1360 = vst.msk [vmem:[#allocation3 + $0xdc] sm:$0xf] %vm1304_vm4, %v1571_v35  ;;  %v939_v50 = vld [vmem:[#allocation2 + $0xd0] sm:$0xff]  ;;  %v812_v60 = vadd.f32 %v1649_v54, %v116_v42  ;;  %v844_v61 = vadd.f32 %v1681_v55, %v148_v43  ;;  %v769_v63 = vpop.f32.mrb[31].mxu1  ;;  %v810_v5 = vadd.f32 %v641_v62, %v114_v48 }
 0x11c   :  { %1326 = vst.msk [vmem:[#allocation3 + $0x54] sm:$0xf] %vm1304_vm4, %v1537_v38  ;;  %1358 = vst.msk [vmem:[#allocation3 + $0xd4] sm:$0xf] %vm1304_vm4, %v1569_v39  ;;  %v971_v51 = vld [vmem:[#allocation2 + $0x1d0] sm:$0xff]  ;;  %v1010_v56 = vadd.f32 %v2059_v3, %v939_v50  ;;  %v937_v58 = vld [vmem:[#allocation2 + $0xc0] sm:$0xff]  ;;  %v842_v6 = vadd.f32 %v769_v63, %v146_v49 }
 0x11d   :  { %v1042_v57 = vadd.f32 %v2059_v3, %v971_v51  ;;  %v969_v59 = vld [vmem:[#allocation2 + $0x1c0] sm:$0xff]  ;;  %876 = vst.msk [vmem:[#allocation2 + $0xf0] sm:$0xff] %vm20_vm3, %v811_v44  ;;  %908 = vst.msk [vmem:[#allocation2 + $0x1f0] sm:$0xff] %vm20_vm3, %v843_v45  ;;  %v1008_v0 = vadd.f32 %v2059_v3, %v937_v58  ;;  %v940_v2 = vld [vmem:[#allocation2 + $0xd8] sm:$0xff] }
 0x11e   :  { %v1040_v1 = vadd.f32 %v2059_v3, %v969_v59  ;;  %v972_v4 = vld [vmem:[#allocation2 + $0x1d8] sm:$0xff]  ;;  %874 = vst.msk [vmem:[#allocation2 + $0xe0] sm:$0xff] %vm20_vm3, %v809_v52  ;;  %906 = vst.msk [vmem:[#allocation2 + $0x1e0] sm:$0xff] %vm20_vm3, %v841_v53  ;;  %v1542_v7 = vpack.c.bf16 %v1010_v56, %v1010_v56  ;;  %v1011_v9 = vadd.f32 %v2059_v3, %v940_v2  ;;  %v938_v11 = vld [vmem:[#allocation2 + $0xc8] sm:$0xff] }
 0x11f   :  { %v1574_v8 = vpack.c.bf16 %v1042_v57, %v1042_v57  ;;  %v1043_v10 = vadd.f32 %v2059_v3, %v972_v4  ;;  %v970_v12 = vld [vmem:[#allocation2 + $0x1c8] sm:$0xff]  ;;  %877 = vst.msk [vmem:[#allocation2 + $0xf8] sm:$0xff] %vm20_vm3, %v812_v60  ;;  %909 = vst.msk [vmem:[#allocation2 + $0x1f8] sm:$0xff] %vm20_vm3, %v844_v61  ;;  %v1540_v13 = vpack.c.bf16 %v1008_v0, %v1008_v0 }
 0x120   :  { %v1572_v14 = vpack.c.bf16 %v1040_v1, %v1040_v1  ;;  %v1009_v15 = vadd.f32 %v2059_v3, %v938_v11  ;;  %v1041_v16 = vadd.f32 %v2059_v3, %v970_v12  ;;  %875 = vst.msk [vmem:[#allocation2 + $0xe8] sm:$0xff] %vm20_vm3, %v810_v5  ;;  %907 = vst.msk [vmem:[#allocation2 + $0x1e8] sm:$0xff] %vm20_vm3, %v842_v6 }
 0x121   :  { %1331 = vst.msk [vmem:[#allocation3 + $0x68] sm:$0xf] %vm1304_vm4, %v1542_v7  ;;  %1363 = vst.msk [vmem:[#allocation3 + $0xe8] sm:$0xf] %vm1304_vm4, %v1574_v8  ;;  %v1543_v17 = vpack.c.bf16 %v1011_v9, %v1011_v9  ;;  %v1575_v18 = vpack.c.bf16 %v1043_v10, %v1043_v10 }
 0x122   :  { %1329 = vst.msk [vmem:[#allocation3 + $0x60] sm:$0xf] %vm1304_vm4, %v1540_v13  ;;  %1361 = vst.msk [vmem:[#allocation3 + $0xe0] sm:$0xf] %vm1304_vm4, %v1572_v14  ;;  %v1541_v19 = vpack.c.bf16 %v1009_v15, %v1009_v15  ;;  %v1573_v20 = vpack.c.bf16 %v1041_v16, %v1041_v16 }
 0x123   :  { %1332 = vst.msk [vmem:[#allocation3 + $0x6c] sm:$0xf] %vm1304_vm4, %v1543_v17  ;;  %1364 = vst.msk [vmem:[#allocation3 + $0xec] sm:$0xf] %vm1304_vm4, %v1575_v18 }
 0x124   :  { %1330 = vst.msk [vmem:[#allocation3 + $0x64] sm:$0xf] %vm1304_vm4, %v1541_v19  ;;  %1362 = vst.msk [vmem:[#allocation3 + $0xe4] sm:$0xf] %vm1304_vm4, %v1573_v20  ;;  %v943_v21 = vld [vmem:[#allocation2 + $0xf0] sm:$0xff] }
 0x125   :  { %v975_v22 = vld [vmem:[#allocation2 + $0x1f0] sm:$0xff]  ;;  %v1014_v23 = vadd.f32 %v2059_v3, %v943_v21  ;;  %v941_v25 = vld [vmem:[#allocation2 + $0xe0] sm:$0xff] }
 0x126   :  { %v1046_v24 = vadd.f32 %v2059_v3, %v975_v22  ;;  %v973_v26 = vld [vmem:[#allocation2 + $0x1e0] sm:$0xff]  ;;  %v1012_v27 = vadd.f32 %v2059_v3, %v941_v25  ;;  %v944_v29 = vld [vmem:[#allocation2 + $0xf8] sm:$0xff] }
 0x127   :  { %v1044_v28 = vadd.f32 %v2059_v3, %v973_v26  ;;  %v976_v30 = vld [vmem:[#allocation2 + $0x1f8] sm:$0xff]  ;;  %v1546_v31 = vpack.c.bf16 %v1014_v23, %v1014_v23  ;;  %v1015_v33 = vadd.f32 %v2059_v3, %v944_v29  ;;  %v942_v35 = vld [vmem:[#allocation2 + $0xe8] sm:$0xff] }
 0x128   :  { %v1578_v32 = vpack.c.bf16 %v1046_v24, %v1046_v24  ;;  %v1047_v34 = vadd.f32 %v2059_v3, %v976_v30  ;;  %v974_v36 = vld [vmem:[#allocation2 + $0x1e8] sm:$0xff]  ;;  %v1544_v37 = vpack.c.bf16 %v1012_v27, %v1012_v27  ;;  %v1013_v39 = vadd.f32 %v2059_v3, %v942_v35 }
 0x129   :  { %v1576_v38 = vpack.c.bf16 %v1044_v28, %v1044_v28  ;;  %v1045_v40 = vadd.f32 %v2059_v3, %v974_v36  ;;  %1335 = vst.msk [vmem:[#allocation3 + $0x78] sm:$0xf] %vm1304_vm4, %v1546_v31  ;;  %v1547_v41 = vpack.c.bf16 %v1015_v33, %v1015_v33 }
 0x12a   :  { %1367 = vst.msk [vmem:[#allocation3 + $0xf8] sm:$0xf] %vm1304_vm4, %v1578_v32  ;;  %v1579_v42 = vpack.c.bf16 %v1047_v34, %v1047_v34  ;;  %1333 = vst.msk [vmem:[#allocation3 + $0x70] sm:$0xf] %vm1304_vm4, %v1544_v37  ;;  %v1545_v43 = vpack.c.bf16 %v1013_v39, %v1013_v39 }
 0x12b   :  { %1365 = vst.msk [vmem:[#allocation3 + $0xf0] sm:$0xf] %vm1304_vm4, %v1576_v38  ;;  %v1577_v44 = vpack.c.bf16 %v1045_v40, %v1045_v40  ;;  %1336 = vst.msk [vmem:[#allocation3 + $0x7c] sm:$0xf] %vm1304_vm4, %v1547_v41 }
 0x12c   :  { %1368 = vst.msk [vmem:[#allocation3 + $0xfc] sm:$0xf] %vm1304_vm4, %v1579_v42  ;;  %1334 = vst.msk [vmem:[#allocation3 + $0x74] sm:$0xf] %vm1304_vm4, %v1545_v43 }
 0x12d   :  { %1366 = vst.msk [vmem:[#allocation3 + $0xf4] sm:$0xf] %vm1304_vm4, %v1577_v44 }
 0x12e   :  { %1736 = shalt.err (!%p1733_p4)
}
 0x12f   :  { %s1737_s28 = scalar_lea.hbm %s2260_s3, 4096 }
 0x130   :  { %p1738_p5 = scmp.ne.s32.totalorder %s2260_s3, %s1737_s28  ;;  %p1741_p6 = scmp.lt.u32.totalorder %s1737_s28, %s2260_s3 }
 0x132   :  { %p1743_p7 = pnand %p1741_p6, %p1738_p5 }
 0x134   :  { %1746 = shalt.err (!%p1743_p7)
}
 0x135   :  { %s1752_s6 = smov 64   ;;  %s1753_s7 = smov 4  }
 0x136   :  { %1380 = dma.vmem_to_hbm [thread:$0]  %s1375_s24, 4096, %s2260_s3, [#allocation4], %s1752_s6, %s1752_s6, %s1753_s7  }
 0x137   :  { %1747 = dma.done.wait [#allocation4], 4096  }
 0x138   :  { %1748 = vsyncadd [#allocation4], 4294963200 }
 0x139   :  { %1384 = vsyncpa [#allocation4], 1 }

</bundles_post_ra>
